<compile_context>
chip_gen: v5e
topology: v5e:2x2
jax: 0.10.0
libtpu: 0.0.40
codegen_flags: <defaults>
</compile_context>

<pallas_src>
import jax
import jax.numpy as jnp
from jax.experimental import pallas as pl
from jax.experimental.pallas import tpu as pltpu


_LANE = 128
_SUBLANE = 8

# Padded (lane-aligned) layer widths; true widths are 400, 100, 25, 2.
_H1, _H2, _H3, _H4 = 512, 128, 128, 128


def _round_up(x, m):
    return (x + m - 1) // m * m


def _plif_mlp_kernel(thr_ref, x_ref, w1_ref, w2_ref, w3_ref, w4_ref, out_ref, acc_ref):
    """Fused 4-layer spiking MLP on one batch tile, layer-1 K-reduction on the grid."""
    k = pl.program_id(1)

    @pl.when(k == 0)
    def _():
        acc_ref[...] = jnp.zeros_like(acc_ref)

    # Layer 1 partial product: bf16 x bf16 on the MXU, f32 accumulation.
    acc_ref[...] += jnp.dot(x_ref[...], w1_ref[...],
                            preferred_element_type=jnp.float32)

    @pl.when(k == pl.num_programs(1) - 1)
    def _():
        # Spikes are exactly 0/1 -> bf16 operands are lossless for layers 2-4.
        s1 = (acc_ref[...] >= thr_ref[0]).astype(jnp.bfloat16)
        z2 = jnp.dot(s1, w2_ref[...], preferred_element_type=jnp.float32)
        s2 = (z2 >= thr_ref[1]).astype(jnp.bfloat16)
        z3 = jnp.dot(s2, w3_ref[...], preferred_element_type=jnp.float32)
        s3 = (z3 >= thr_ref[2]).astype(jnp.bfloat16)
        z4 = jnp.dot(s3, w4_ref[...], preferred_element_type=jnp.float32)
        # NOTE: keep ">=" — SpikingJelly heaviside returns 1 at exactly 0.
        out_ref[...] = (z4 >= thr_ref[3]).astype(out_ref.dtype)


def ncarsnet_1_forward(x, params, *, tile_n=None, tile_k=1024):
    """x: [N, C, H, W] (NCHW, as in PyTorch). Returns spikes [N, 2] (0/1 float32)."""
    w1, w2, w3, w4, plif_w = params
    N = x.shape[0]
    d0 = w1.shape[0]
    x2d = x.reshape(N, -1)                                   # Flatten (glue, plain JAX)

    # --- layer-1 K tiling (bounds VMEM regardless of d0) ---
    tile_k = max(_LANE, _round_up(min(tile_k, _round_up(d0, _LANE)), _LANE))
    d0p = _round_up(d0, tile_k)
    num_k = d0p // tile_k

    # --- batch tiling (sublane-aligned; >=2 tiles when possible for v7x dual-TC) ---
    if tile_n is None:
        tile_n = 1024 if d0p <= 4096 else 512
    tile_n = _round_up(max(int(tile_n), _SUBLANE), _SUBLANE)
    n_base = _round_up(max(N, 1), _SUBLANE)
    if n_base >= 2 * _SUBLANE:
        tile_n = min(tile_n, _round_up(n_base // 2, _SUBLANE))
    else:
        tile_n = min(tile_n, n_base)
    n_pad = _round_up(n_base, tile_n)
    num_tiles = n_pad // tile_n

    # --- padded operands (zero padding is exact, see header); single fused cast+pad ---
    xp = jnp.pad(x2d.astype(jnp.bfloat16), ((0, n_pad - N), (0, d0p - d0)))
    w1p = jnp.pad(w1.astype(jnp.bfloat16), ((0, d0p - d0), (0, _H1 - w1.shape[1])))
    w2p = jnp.pad(w2.astype(jnp.bfloat16), ((0, _H1 - w2.shape[0]), (0, _H2 - w2.shape[1])))
    w3p = jnp.pad(w3.astype(jnp.bfloat16), ((0, _H2 - w3.shape[0]), (0, _H3 - w3.shape[1])))
    w4p = jnp.pad(w4.astype(jnp.bfloat16), ((0, _H3 - w4.shape[0]), (0, _H4 - w4.shape[1])))

    # spike = (z * sigmoid(w) >= 1)  <=>  (z >= 1/sigmoid(w))
    thr = (1.0 / jax.nn.sigmoid(plif_w)).astype(jnp.float32)

    # --- scheduling hints ---
    flops = 2 * n_pad * (d0p * _H1 + _H1 * _H2 + _H2 * _H3 + _H3 * _H4)
    bytes_accessed = (xp.size * 2 + num_tiles * w1p.size * 2
                      + (w2p.size + w3p.size + w4p.size) * 2 + n_pad * _H4 * 2)
    cost = pl.CostEstimate(flops=flops, transcendentals=0,
                           bytes_accessed=bytes_accessed)

    # Generation-aware VMEM budget (<= 3/4 of physical: ~48 MiB v7x, ~96 MiB v5e/v6e).
    try:
        vmem_cap = int(pltpu.get_tpu_info().vmem_capacity_bytes)
    except Exception:
        vmem_cap = 64 << 20                      # conservative fallback (v7x per-core)
    vmem_need = (2 * tile_n * tile_k * 2                         # x tiles, 2x, bf16
                 + 2 * tile_k * _H1 * 2                          # w1 K-blocks, 2x, bf16
                 + 2 * (_H1 * _H2 + _H2 * _H3 + _H3 * _H4) * 2   # w2-4 (worst case 2x)
                 + tile_n * _H1 * 4                              # f32 accumulator scratch
                 + 2 * tile_n * _H4 * 2)                         # out tiles, 2x, bf16
    vmem_limit = int(min(max(vmem_need * 3 // 2 + (2 << 20), 16 << 20),
                         (vmem_cap * 3) // 4))

    out = pl.pallas_call(
        _plif_mlp_kernel,
        out_shape=jax.ShapeDtypeStruct((n_pad, _H4), jnp.bfloat16),
        grid_spec=pltpu.PrefetchScalarGridSpec(
            num_scalar_prefetch=1,                       # thresholds -> SMEM
            grid=(num_tiles, num_k),                     # (batch parallel, K reduction)
            in_specs=[
                pl.BlockSpec((tile_n, tile_k), lambda i, k, _thr: (i, k)),   # x
                pl.BlockSpec((tile_k, _H1),    lambda i, k, _thr: (k, 0)),   # w1 K-block
                pl.BlockSpec((_H1, _H2),       lambda i, k, _thr: (0, 0)),   # w2 resident
                pl.BlockSpec((_H2, _H3),       lambda i, k, _thr: (0, 0)),   # w3 resident
                pl.BlockSpec((_H3, _H4),       lambda i, k, _thr: (0, 0)),   # w4 resident
            ],
            out_specs=pl.BlockSpec((tile_n, _H4), lambda i, k, _thr: (i, 0)),
            scratch_shapes=[pltpu.VMEM((tile_n, _H1), jnp.float32)],
        ),
        compiler_params=pltpu.CompilerParams(
            dimension_semantics=("parallel", "arbitrary"),
            vmem_limit_bytes=vmem_limit),
        cost_estimate=cost,
    )(thr, xp, w1p, w2p, w3p, w4p)

    # strip batch padding and the lane padding of the final layer (true width = 2)
    return out[:N, :w4.shape[1]].astype(jnp.float32)


def init_params(key, d0):
    """Deterministic parameter init (PyTorch-Linear-style uniform, bias=False)."""
    dims = [d0, 400, 100, 25, 2]
    keys = jax.random.split(key, 4)
    weights = []
    for i in range(4):
        fan_in, fan_out = dims[i], dims[i + 1]
        bound = 1.0 / jnp.sqrt(jnp.float32(fan_in))
        # stored as [in, out] (transpose of torch's [out, in]) for x @ W
        w = jax.random.uniform(keys[i], (fan_in, fan_out), jnp.float32,
                               minval=-bound, maxval=bound)
        weights.append(w)
    # ParametricLIF learnable w, init_tau = 2.0  ->  w = -log(tau - 1) = 0.0
    plif_w = jnp.zeros((4,), jnp.float32)
    return (*weights, plif_w)


if __name__ == "__main__":
    # Small shapes consistent with the module: the original uses image_size = 120*100;
    # here the flattened dim is 4*16*16 = 1024 (hidden sizes 400/100/25/2 unchanged).
    key = jax.random.PRNGKey(0)
    k_x, k_p = jax.random.split(key)

    N, C, H, W = 2, 4, 16, 16
    x = jax.random.normal(k_x, (N, C, H, W), jnp.float32)

    params = init_params(k_p, C * H * W)

    out = ncarsnet_1_forward(x, params)
    out = jax.block_until_ready(out)

    assert out.shape == (N, 2)
    assert out.dtype == jnp.float32
    # spikes must be exactly 0 or 1
    assert bool(jnp.all((out == 0.0) | (out == 1.0)))
    print("KERNEL_OK")
</pallas_src>

<mosaic_0001>
module attributes {stable_mosaic.version = 11 : i64} {
  func.func @_plif_mlp_kernel(%arg0: i32, %arg1: i32, %arg2: memref<4xf32, #tpu.memory_space<smem>>, %arg3: memref<8x1024xbf16, #tpu.memory_space<vmem>>, %arg4: memref<1024x512xbf16, #tpu.memory_space<vmem>>, %arg5: memref<512x128xbf16, #tpu.memory_space<vmem>>, %arg6: memref<128x128xbf16, #tpu.memory_space<vmem>>, %arg7: memref<128x128xbf16, #tpu.memory_space<vmem>>, %arg8: memref<8x128xbf16, #tpu.memory_space<vmem>>, %arg9: memref<8x512xf32, #tpu.memory_space<vmem>>) attributes {dimension_semantics = [#tpu.dimension_semantics<parallel>, #tpu.dimension_semantics<arbitrary>], iteration_bounds = array<i64: 1, 1>, scalar_prefetch = 1 : i64, scratch_operands = 1 : i64, tpu.core_type = #tpu.core_type<tc>, window_params = [{transform_indices = @transform_0, window_bounds = array<i64: 8, 1024>}, {transform_indices = @transform_1, window_bounds = array<i64: 1024, 512>}, {pipeline_mode = #tpu.pipeline_mode<synchronous>, transform_indices = @transform_2, window_bounds = array<i64: 512, 128>}, {pipeline_mode = #tpu.pipeline_mode<synchronous>, transform_indices = @transform_3, window_bounds = array<i64: 128, 128>}, {pipeline_mode = #tpu.pipeline_mode<synchronous>, transform_indices = @transform_4, window_bounds = array<i64: 128, 128>}, {transform_indices = @transform_5, window_bounds = array<i64: 8, 128>}]} {
    %c0_i32 = arith.constant 0 : i32
    %0 = arith.cmpi eq, %arg1, %c0_i32 : i32
    %1 = arith.extui %0 : i1 to i32
    %c0_i32_0 = arith.constant 0 : i32
    %2 = arith.cmpi ne, %1, %c0_i32_0 : i32
    scf.if %2 {
      %cst_10 = arith.constant 0.000000e+00 : f32
      %12 = vector.broadcast %cst_10 : f32 to vector<8x512xf32>
      %c0_11 = arith.constant 0 : index
      %c0_12 = arith.constant 0 : index
      %13 = vector.load %arg9[%c0_11, %c0_12] : memref<8x512xf32, #tpu.memory_space<vmem>>, vector<8x512xf32>
      tpu.vector_store %arg9[%c0_11, %c0_12], %12 {strides = array<i32>} : memref<8x512xf32, #tpu.memory_space<vmem>>, vector<8x512xf32>,
    } else {
    }
    %c0 = arith.constant 0 : index
    %c0_1 = arith.constant 0 : index
    %3 = vector.load %arg9[%c0, %c0_1] : memref<8x512xf32, #tpu.memory_space<vmem>>, vector<8x512xf32>
    %c0_2 = arith.constant 0 : index
    %c0_3 = arith.constant 0 : index
    %4 = vector.load %arg3[%c0_2, %c0_3] : memref<8x1024xbf16, #tpu.memory_space<vmem>>, vector<8x1024xbf16>
    %c0_4 = arith.constant 0 : index
    %c0_5 = arith.constant 0 : index
    %5 = vector.load %arg4[%c0_4, %c0_5] : memref<1024x512xbf16, #tpu.memory_space<vmem>>, vector<1024x512xbf16>
    %cst = arith.constant dense<0.000000e+00> : vector<8x512xf32>
    %6 = tpu.matmul %4, %5, %cst {dimension_numbers = #tpu.dot_dimension_numbers<[1], [0], [0], [1], [0, 0, 1, 1], [], []>} : vector<8x1024xbf16>, vector<1024x512xbf16>, vector<8x512xf32> -> vector<8x512xf32>
    %7 = arith.addf %3, %6 : vector<8x512xf32>
    %c0_6 = arith.constant 0 : index
    %c0_7 = arith.constant 0 : index
    %8 = vector.load %arg9[%c0_6, %c0_7] : memref<8x512xf32, #tpu.memory_space<vmem>>, vector<8x512xf32>
    tpu.vector_store %arg9[%c0_6, %c0_7], %7 {strides = array<i32>} : memref<8x512xf32, #tpu.memory_space<vmem>>, vector<8x512xf32>,
    %c0_i32_8 = arith.constant 0 : i32
    %9 = arith.cmpi eq, %arg1, %c0_i32_8 : i32
    %10 = arith.extui %9 : i1 to i32
    %c0_i32_9 = arith.constant 0 : i32
    %11 = arith.cmpi ne, %10, %c0_i32_9 : i32
    scf.if %11 {
      %c0_10 = arith.constant 0 : index
      %c0_11 = arith.constant 0 : index
      %12 = vector.load %arg9[%c0_10, %c0_11] : memref<8x512xf32, #tpu.memory_space<vmem>>, vector<8x512xf32>
      %c0_12 = arith.constant 0 : index
      %13 = memref.load %arg2[%c0_12] : memref<4xf32, #tpu.memory_space<smem>>
      %14 = vector.broadcast %13 : f32 to vector<8x512xf32>
      %15 = arith.cmpf oge, %12, %14 : vector<8x512xf32>
      %16 = arith.extui %15 : vector<8x512xi1> to vector<8x512xi32>
      %17 = arith.sitofp %16 : vector<8x512xi32> to vector<8x512xf32>
      %18 = arith.truncf %17 : vector<8x512xf32> to vector<8x512xbf16>
      %c0_13 = arith.constant 0 : index
      %c0_14 = arith.constant 0 : index
      %19 = vector.load %arg5[%c0_13, %c0_14] : memref<512x128xbf16, #tpu.memory_space<vmem>>, vector<512x128xbf16>
      %cst_15 = arith.constant dense<0.000000e+00> : vector<8x128xf32>
      %20 = tpu.matmul %18, %19, %cst_15 {dimension_numbers = #tpu.dot_dimension_numbers<[1], [0], [0], [1], [0, 0, 1, 1], [], []>} : vector<8x512xbf16>, vector<512x128xbf16>, vector<8x128xf32> -> vector<8x128xf32>
      %c1 = arith.constant 1 : index
      %21 = memref.load %arg2[%c1] : memref<4xf32, #tpu.memory_space<smem>>
      %22 = vector.broadcast %21 : f32 to vector<8x128xf32>
      %23 = arith.cmpf oge, %20, %22 : vector<8x128xf32>
      %24 = arith.extui %23 : vector<8x128xi1> to vector<8x128xi32>
      %25 = arith.sitofp %24 : vector<8x128xi32> to vector<8x128xf32>
      %26 = arith.truncf %25 : vector<8x128xf32> to vector<8x128xbf16>
      %c0_16 = arith.constant 0 : index
      %c0_17 = arith.constant 0 : index
      %27 = vector.load %arg6[%c0_16, %c0_17] : memref<128x128xbf16, #tpu.memory_space<vmem>>, vector<128x128xbf16>
      %cst_18 = arith.constant dense<0.000000e+00> : vector<8x128xf32>
      %28 = tpu.matmul %26, %27, %cst_18 {dimension_numbers = #tpu.dot_dimension_numbers<[1], [0], [0], [1], [0, 0, 1, 1], [], []>} : vector<8x128xbf16>, vector<128x128xbf16>, vector<8x128xf32> -> vector<8x128xf32>
      %c2 = arith.constant 2 : index
      %29 = memref.load %arg2[%c2] : memref<4xf32, #tpu.memory_space<smem>>
      %30 = vector.broadcast %29 : f32 to vector<8x128xf32>
      %31 = arith.cmpf oge, %28, %30 : vector<8x128xf32>
      %32 = arith.extui %31 : vector<8x128xi1> to vector<8x128xi32>
      %33 = arith.sitofp %32 : vector<8x128xi32> to vector<8x128xf32>
      %34 = arith.truncf %33 : vector<8x128xf32> to vector<8x128xbf16>
      %c0_19 = arith.constant 0 : index
      %c0_20 = arith.constant 0 : index
      %35 = vector.load %arg7[%c0_19, %c0_20] : memref<128x128xbf16, #tpu.memory_space<vmem>>, vector<128x128xbf16>
      %cst_21 = arith.constant dense<0.000000e+00> : vector<8x128xf32>
      %36 = tpu.matmul %34, %35, %cst_21 {dimension_numbers = #tpu.dot_dimension_numbers<[1], [0], [0], [1], [0, 0, 1, 1], [], []>} : vector<8x128xbf16>, vector<128x128xbf16>, vector<8x128xf32> -> vector<8x128xf32>
      %c3 = arith.constant 3 : index
      %37 = memref.load %arg2[%c3] : memref<4xf32, #tpu.memory_space<smem>>
      %38 = vector.broadcast %37 : f32 to vector<8x128xf32>
      %39 = arith.cmpf oge, %36, %38 : vector<8x128xf32>
      %40 = arith.extui %39 : vector<8x128xi1> to vector<8x128xi32>
      %41 = arith.sitofp %40 : vector<8x128xi32> to vector<8x128xf32>
      %42 = arith.truncf %41 : vector<8x128xf32> to vector<8x128xbf16>
      %c0_22 = arith.constant 0 : index
      %c0_23 = arith.constant 0 : index
      %43 = vector.load %arg8[%c0_22, %c0_23] : memref<8x128xbf16, #tpu.memory_space<vmem>>, vector<8x128xbf16>
      tpu.vector_store %arg8[%c0_22, %c0_23], %42 {strides = array<i32>} : memref<8x128xbf16, #tpu.memory_space<vmem>>, vector<8x128xbf16>,
    } else {
    }
    return
  }
  func.func @transform_0(%arg0: i32, %arg1: i32, %arg2: memref<4xf32, #tpu.memory_space<smem>>) -> (i32, i32) {
    %c0_i32 = arith.constant 0 : i32
    return %arg0, %arg1 : i32, i32
  }
  func.func @transform_1(%arg0: i32, %arg1: i32, %arg2: memref<4xf32, #tpu.memory_space<smem>>) -> (i32, i32) {
    %c0_i32 = arith.constant 0 : i32
    %c0_i32_0 = arith.constant 0 : i32
    return %arg1, %c0_i32 : i32, i32
  }
  func.func @transform_2(%arg0: i32, %arg1: i32, %arg2: memref<4xf32, #tpu.memory_space<smem>>) -> (i32, i32) {
    %c0_i32 = arith.constant 0 : i32
    %c0_i32_0 = arith.constant 0 : i32
    %c0_i32_1 = arith.constant 0 : i32
    return %c0_i32, %c0_i32_0 : i32, i32
  }
  func.func @transform_3(%arg0: i32, %arg1: i32, %arg2: memref<4xf32, #tpu.memory_space<smem>>) -> (i32, i32) {
    %c0_i32 = arith.constant 0 : i32
    %c0_i32_0 = arith.constant 0 : i32
    %c0_i32_1 = arith.constant 0 : i32
    return %c0_i32, %c0_i32_0 : i32, i32
  }
  func.func @transform_4(%arg0: i32, %arg1: i32, %arg2: memref<4xf32, #tpu.memory_space<smem>>) -> (i32, i32) {
    %c0_i32 = arith.constant 0 : i32
    %c0_i32_0 = arith.constant 0 : i32
    %c0_i32_1 = arith.constant 0 : i32
    return %c0_i32, %c0_i32_0 : i32, i32
  }
  func.func @transform_5(%arg0: i32, %arg1: i32, %arg2: memref<4xf32, #tpu.memory_space<smem>>) -> (i32, i32) {
    %c0_i32 = arith.constant 0 : i32
    %c0_i32_0 = arith.constant 0 : i32
    return %arg0, %c0_i32 : i32, i32
  }
}

</mosaic_0001>

<bundles_post_ra>
// kernel: tpu_custom_call.1
= control target key start
LH: loop header
LB: loop body
LE: loop exit
PB: predicated region body
PF: predicated region fallthrough
CT: control target
= control target key end

     0   :  { %s4356_s24 = smov [#allocation4]   ;;  %s4503_s0 = inlined_call_operand.hbm [shape: f32[4], index: 0, kind: input, shape index: {}]   ;;  %s4504_s1 = inlined_call_operand.hbm [shape: bf16[8,1024], index: 1, kind: input, shape index: {}]   ;;  %s4505_s2 = inlined_call_operand.hbm [shape: bf16[1024,512], index: 2, kind: input, shape index: {}]   ;;  %s4506_s3 = inlined_call_operand.hbm [shape: bf16[512,128], index: 3, kind: input, shape index: {}]   ;;  %s4507_s4 = inlined_call_operand.hbm [shape: bf16[128,128], index: 4, kind: input, shape index: {}]   ;;  %s4508_s5 = inlined_call_operand.hbm [shape: bf16[128,128], index: 5, kind: input, shape index: {}]   ;;  %s4509_s6 = inlined_call_operand.hbm [shape: bf16[8,128], index: 6, kind: output, shape index: {}]  }
   0x1   :  { %s12_s23 = sshll.u32 %s4503_s0, 4  ;;  %s13_s23 = int_to_ptr.hbm [resolvable:$true] %s12_s23 }
   0x2   :  { %15 = dma.hbm_to_smem %s13_s23, 16, %s4356_s24, [#allocation3] }
   0x3   :  { %4346 = dma.done.wait [#allocation3], 16 }
   0x4   :  { %4347 = vsyncadd [#allocation3], 4294967280 }
   0x5   :  { %18 = sfence }
   0x6   :  { %19 = vsyncpa [#allocation6], 0 }
   0x7   :  { %20 = vsyncpa [#allocation9], 0 }
   0x8   :  { %21 = vsyncpa [#allocation12], 0  ;;  %s38_s27 = sshll.u32 %s4505_s2, 4  ;;  %s39_s27 = int_to_ptr.hbm [resolvable:$true] %s38_s27 }
   0x9   :  { %22 = vsyncpa [#allocation7], 0  ;;  %s4357_s28 = smov [#allocation8]   ;;  %s4358_s30 = smov 256  }
   0xa   :  { %s40_s29 = sshll.u32 %s4357_s28, 4  ;;  %s4359_s0 = smov 16   ;;  %s41_s29 = int_to_ptr.vmem [resolvable:$true] %s40_s29 }
   0xb   :  { %46 = dma.hbm_to_vmem [thread:$0]  %s39_s27, 32768, %s41_s29, [#allocation9], %s4358_s30, %s4358_s30, %s4359_s0  }
   0xc   :  { %s64_s9 = sshll.u32 %s4507_s4, 4  ;;  %s4360_s10 = smov [#allocation11]   ;;  %s65_s9 = int_to_ptr.hbm [resolvable:$true] %s64_s9 }
   0xd   :  { %s66_s11 = sshll.u32 %s4360_s10, 4  ;;  %s28_s14 = sshll.u32 %s4504_s1, 4  ;;  %s67_s11 = int_to_ptr.vmem [resolvable:$true] %s66_s11  ;;  %s29_s14 = int_to_ptr.hbm [resolvable:$true] %s28_s14 }
   0xe   :  { %s4361_s2 = smov 64   ;;  %s4362_s15 = smov 4  }
   0xf   :  { %72 = dma.hbm_to_vmem [thread:$0]  %s65_s9, 1024, %s67_s11, [#allocation12], %s4361_s2, %s4361_s2, %s4362_s15  }
  0x10   :  { %s51_s18 = sshll.u32 %s4506_s3, 4  ;;  %s4363_s19 = smov [#allocation5]   ;;  %s52_s18 = int_to_ptr.hbm [resolvable:$true] %s51_s18 }
  0x11   :  { %s30_s20 = sshll.u32 %s4363_s19, 4  ;;  %s4364_s4 = smov [#allocation10]   ;;  %s31_s20 = int_to_ptr.vmem [resolvable:$true] %s30_s20 }
  0x12   :  { %33 = dma.hbm_to_vmem [thread:$0]  %s29_s14, 512, %s31_s20, [#allocation6]  }
  0x13   :  { %s53_s21 = sshll.u32 %s4364_s4, 4  ;;  %s77_s1 = sshll.u32 %s4508_s5, 4  ;;  %s54_s21 = int_to_ptr.vmem [resolvable:$true] %s53_s21  ;;  %s78_s1 = int_to_ptr.hbm [resolvable:$true] %s77_s1 }
  0x14   :  { %59 = dma.hbm_to_vmem [thread:$0]  %s52_s18, 4096, %s54_s21, [#allocation9], %s4361_s2, %s4361_s2, %s4362_s15  }
  0x15   :  { %s4365_s24 = smov [#allocation13]  }
  0x16   :  { %s79_s25 = sshll.u32 %s4365_s24, 4  ;;  %s80_s25 = int_to_ptr.vmem [resolvable:$true] %s79_s25 }
  0x17   :  { %85 = dma.hbm_to_vmem [thread:$0]  %s78_s1, 1024, %s80_s25, [#allocation12], %s4361_s2, %s4361_s2, %s4362_s15  }
  0x18   :  { %4348 = dma.done.wait [#allocation6], 512  }
  0x19   :  { %4349 = vsyncadd [#allocation6], 4294966784 }
  0x1a   :  { %4350 = dma.done.wait [#allocation9], 36864  }
  0x1b   :  { %4351 = vsyncadd [#allocation9], 4294930432 }
  0x1c   :  { %4352 = dma.done.wait [#allocation12], 2048  }
  0x1d   :  { %4353 = vsyncadd [#allocation12], 4294965248  ;;  %v2749_v0 = vld [vmem:[#allocation8 + $0xe0] sm:$0xf]  ;;  %v3903_v1 = vld [vmem:[#allocation8 + $0xec] sm:$0xf0] }
  0x1e   :  { %v2877_v2 = vld [vmem:[#allocation8 + $0x1e0] sm:$0xf]  ;;  %v2750_v3 = vor.u32 %v3903_v1, %v2749_v0  ;;  %v3935_v4 = vld [vmem:[#allocation8 + $0x1ec] sm:$0xf0]  ;;  %s2117_s3 = sld [smem:[#allocation4]]  ;;  %s4367_s28 = smov [#allocation14]  }
  0x1f   :  { %v3005_v5 = vld [vmem:[#allocation8 + $0x2e0] sm:$0xf]  ;;  %v3967_v6 = vld [vmem:[#allocation8 + $0x2ec] sm:$0xf0]  ;;  %v2878_v7 = vor.u32 %v3935_v4, %v2877_v2  ;;  %s3799_s5 = sld [smem:[#allocation4 + $0x1]]  ;;  %s2621_s29 = sshll.u32 %s4367_s28, 4  ;;  %s2622_s29 = int_to_ptr.vmem [resolvable:$true] %s2621_s29 }
  0x20   :  { %v3006_v8 = vor.u32 %v3967_v6, %v3005_v5  ;;  %v3133_v9 = vld [vmem:[#allocation8 + $0x3e0] sm:$0xf]  ;;  %v3999_v10 = vld [vmem:[#allocation8 + $0x3ec] sm:$0xf0]  ;;  %1686 = vmatpush.bf16.msra.mxu0 %v2750_v3  ;;  %s3835_s26 = sld [smem:[#allocation4 + $0x2]]  ;;  %s2623_s7 = sshll.u32 %s4509_s6, 4  ;;  %s2624_s7 = int_to_ptr.hbm [resolvable:$true] %s2623_s7 }
  0x21   :  { %v2733_v11 = vld [vmem:[#allocation8 + $0xc0] sm:$0xf]  ;;  %v3134_v12 = vor.u32 %v3999_v10, %v3133_v9  ;;  %v3899_v13 = vld [vmem:[#allocation8 + $0xcc] sm:$0xf0]  ;;  %1699 = vmatpush.bf16.msra.mxu1 %v2878_v7  ;;  %s3871_s27 = sld [smem:[#allocation4 + $0x3]] }
  0x22   :  { %v2861_v14 = vld [vmem:[#allocation8 + $0x1c0] sm:$0xf]  ;;  %v3931_v15 = vld [vmem:[#allocation8 + $0x1cc] sm:$0xf0]  ;;  %1712 = vmatpush.bf16.msra.mxu2 %v3006_v8  ;;  %v2734_v16 = vor.u32 %v3899_v13, %v2733_v11 }
  0x23   :  { %v2862_v17 = vor.u32 %v3931_v15, %v2861_v14  ;;  %v2989_v18 = vld [vmem:[#allocation8 + $0x2c0] sm:$0xf]  ;;  %v3963_v19 = vld [vmem:[#allocation8 + $0x2cc] sm:$0xf0]  ;;  %1725 = vmatpush.bf16.msra.mxu3 %v3134_v12 }
  0x24   :  { %v3117_v20 = vld [vmem:[#allocation8 + $0x3c0] sm:$0xf]  ;;  %v2990_v21 = vor.u32 %v3963_v19, %v2989_v18  ;;  %v3995_v22 = vld [vmem:[#allocation8 + $0x3cc] sm:$0xf0]  ;;  %1687 = vmatpush.bf16.msra.mxu0 %v2734_v16 }
  0x25   :  { %v2717_v23 = vld [vmem:[#allocation8 + $0xa0] sm:$0xf]  ;;  %v3895_v24 = vld [vmem:[#allocation8 + $0xac] sm:$0xf0]  ;;  %v3118_v25 = vor.u32 %v3995_v22, %v3117_v20  ;;  %1700 = vmatpush.bf16.msra.mxu1 %v2862_v17 }
  0x26   :  { %v2845_v26 = vld [vmem:[#allocation8 + $0x1a0] sm:$0xf]  ;;  %v3927_v27 = vld [vmem:[#allocation8 + $0x1ac] sm:$0xf0]  ;;  %v2718_v29 = vor.u32 %v3895_v24, %v2717_v23  ;;  %1713 = vmatpush.bf16.msra.mxu2 %v2990_v21 }
  0x27   :  { %v2973_v28 = vld [vmem:[#allocation8 + $0x2a0] sm:$0xf]  ;;  %v3959_v30 = vld [vmem:[#allocation8 + $0x2ac] sm:$0xf0]  ;;  %v2846_v33 = vor.u32 %v3927_v27, %v2845_v26  ;;  %1726 = vmatpush.bf16.msra.mxu3 %v3118_v25 }
  0x28   :  { %v3101_v31 = vld [vmem:[#allocation8 + $0x3a0] sm:$0xf]  ;;  %v3991_v32 = vld [vmem:[#allocation8 + $0x3ac] sm:$0xf0]  ;;  %v2974_v34 = vor.u32 %v3959_v30, %v2973_v28  ;;  %1688 = vmatpush.bf16.msra.mxu0 %v2718_v29 }
  0x29   :  { %v2701_v35 = vld [vmem:[#allocation8 + $0x80] sm:$0xf]  ;;  %v3891_v36 = vld [vmem:[#allocation8 + $0x8c] sm:$0xf0]  ;;  %v3102_v38 = vor.u32 %v3991_v32, %v3101_v31  ;;  %1701 = vmatpush.bf16.msra.mxu1 %v2846_v33 }
  0x2a   :  { %v2829_v37 = vld [vmem:[#allocation8 + $0x180] sm:$0xf]  ;;  %v3923_v39 = vld [vmem:[#allocation8 + $0x18c] sm:$0xf0]  ;;  %v2702_v44 = vor.u32 %v3891_v36, %v2701_v35  ;;  %1714 = vmatpush.bf16.msra.mxu2 %v2974_v34 }
  0x2b   :  { %v2957_v40 = vld [vmem:[#allocation8 + $0x280] sm:$0xf]  ;;  %v3955_v41 = vld [vmem:[#allocation8 + $0x28c] sm:$0xf0]  ;;  %v2830_v45 = vor.u32 %v3923_v39, %v2829_v37  ;;  %1727 = vmatpush.bf16.msra.mxu3 %v3102_v38 }
  0x2c   :  { %v3085_v42 = vld [vmem:[#allocation8 + $0x380] sm:$0xf]  ;;  %v3987_v43 = vld [vmem:[#allocation8 + $0x38c] sm:$0xf0]  ;;  %v2958_v46 = vor.u32 %v3955_v41, %v2957_v40  ;;  %1689 = vmatpush.bf16.msra.mxu0 %v2702_v44 }
  0x2d   :  { %v2685_v47 = vld [vmem:[#allocation8 + $0x60] sm:$0xf]  ;;  %v3887_v48 = vld [vmem:[#allocation8 + $0x6c] sm:$0xf0]  ;;  %v3086_v50 = vor.u32 %v3987_v43, %v3085_v42  ;;  %1702 = vmatpush.bf16.msra.mxu1 %v2830_v45 }
  0x2e   :  { %v2813_v49 = vld [vmem:[#allocation8 + $0x160] sm:$0xf]  ;;  %v3919_v51 = vld [vmem:[#allocation8 + $0x16c] sm:$0xf0]  ;;  %v2686_v56 = vor.u32 %v3887_v48, %v2685_v47  ;;  %1715 = vmatpush.bf16.msra.mxu2 %v2958_v46 }
  0x2f   :  { %v2941_v52 = vld [vmem:[#allocation8 + $0x260] sm:$0xf]  ;;  %v3951_v53 = vld [vmem:[#allocation8 + $0x26c] sm:$0xf0]  ;;  %v2814_v57 = vor.u32 %v3919_v51, %v2813_v49  ;;  %1728 = vmatpush.bf16.msra.mxu3 %v3086_v50 }
  0x30   :  { %v3069_v54 = vld [vmem:[#allocation8 + $0x360] sm:$0xf]  ;;  %v3983_v55 = vld [vmem:[#allocation8 + $0x36c] sm:$0xf0]  ;;  %v2942_v58 = vor.u32 %v3951_v53, %v2941_v52  ;;  %1690 = vmatpush.bf16.msra.mxu0 %v2686_v56 }
  0x31   :  { %v2669_v59 = vld [vmem:[#allocation8 + $0x40] sm:$0xf]  ;;  %v3883_v60 = vld [vmem:[#allocation8 + $0x4c] sm:$0xf0]  ;;  %v3070_v62 = vor.u32 %v3983_v55, %v3069_v54  ;;  %1703 = vmatpush.bf16.msra.mxu1 %v2814_v57 }
  0x32   :  { %v2797_v61 = vld [vmem:[#allocation8 + $0x140] sm:$0xf]  ;;  %v3915_v63 = vld [vmem:[#allocation8 + $0x14c] sm:$0xf0]  ;;  %v2670_v4 = vor.u32 %v3883_v60, %v2669_v59  ;;  %1716 = vmatpush.bf16.msra.mxu2 %v2942_v58  ;;  %v119_v58 = vld [vmem:[#allocation5 + $0x8] sm:$0xff] }
  0x33   :  { %v2925_v0 = vld [vmem:[#allocation8 + $0x240] sm:$0xf]  ;;  %v3947_v1 = vld [vmem:[#allocation8 + $0x24c] sm:$0xf0]  ;;  %v2798_v5 = vor.u32 %v3915_v63, %v2797_v61  ;;  %1729 = vmatpush.bf16.msra.mxu3 %v3070_v62  ;;  %v384_v63 = vunpack.c.l.b16 %v119_v58 }
  0x34   :  { %v3053_v2 = vld [vmem:[#allocation8 + $0x340] sm:$0xf]  ;;  %v3979_v3 = vld [vmem:[#allocation8 + $0x34c] sm:$0xf0]  ;;  %v2926_v6 = vor.u32 %v3947_v1, %v2925_v0  ;;  %1691 = vmatpush.bf16.msra.mxu0 %v2670_v4  ;;  %v385_v0 = vunpack.c.h.b16 %v119_v58 }
  0x35   :  { %v2653_v7 = vld [vmem:[#allocation8 + $0x20] sm:$0xf]  ;;  %v3879_v8 = vld [vmem:[#allocation8 + $0x2c] sm:$0xf0]  ;;  %v3054_v10 = vor.u32 %v3979_v3, %v3053_v2  ;;  %1704 = vmatpush.bf16.msra.mxu1 %v2798_v5  ;;  %v4422_v4 = vpack.c.b16 %v384_v63, %v384_v63 }
  0x36   :  { %v2781_v9 = vld [vmem:[#allocation8 + $0x120] sm:$0xf]  ;;  %v3911_v11 = vld [vmem:[#allocation8 + $0x12c] sm:$0xf0]  ;;  %v2654_v16 = vor.u32 %v3879_v8, %v2653_v7  ;;  %1717 = vmatpush.bf16.msra.mxu2 %v2926_v6  ;;  %v4424_v6 = vpack.c.b16 %v385_v0, %v385_v0 }
  0x37   :  { %v2909_v12 = vld [vmem:[#allocation8 + $0x220] sm:$0xf]  ;;  %v3943_v13 = vld [vmem:[#allocation8 + $0x22c] sm:$0xf0]  ;;  %v2782_v19 = vor.u32 %v3911_v11, %v2781_v9  ;;  %1730 = vmatpush.bf16.msra.mxu3 %v3054_v10 }
  0x38   :  { %v3037_v14 = vld [vmem:[#allocation8 + $0x320] sm:$0xf]  ;;  %v3975_v15 = vld [vmem:[#allocation8 + $0x32c] sm:$0xf0]  ;;  %v2910_v20 = vor.u32 %v3943_v13, %v2909_v12  ;;  %1692 = vmatpush.bf16.msra.mxu0 %v2654_v16 }
  0x39   :  { %v2637_v17 = vld [vmem:[#allocation8] sm:$0xf]  ;;  %v3875_v18 = vld [vmem:[#allocation8 + $0xc] sm:$0xf0]  ;;  %v3038_v24 = vor.u32 %v3975_v15, %v3037_v14  ;;  %1705 = vmatpush.bf16.msra.mxu1 %v2782_v19 }
  0x3a   :  { %v2765_v21 = vld [vmem:[#allocation8 + $0x100] sm:$0xf]  ;;  %v3907_v22 = vld [vmem:[#allocation8 + $0x10c] sm:$0xf0]  ;;  %v2638_v31 = vor.u32 %v3875_v18, %v2637_v17  ;;  %1718 = vmatpush.bf16.msra.mxu2 %v2910_v20 }
  0x3b   :  { %v2893_v23 = vld [vmem:[#allocation8 + $0x200] sm:$0xf]  ;;  %v3939_v25 = vld [vmem:[#allocation8 + $0x20c] sm:$0xf0]  ;;  %v2766_v35 = vor.u32 %v3907_v22, %v2765_v21  ;;  %1731 = vmatpush.bf16.msra.mxu3 %v3038_v24 }
  0x3c   :  { %v3021_v26 = vld [vmem:[#allocation8 + $0x300] sm:$0xf]  ;;  %v3971_v27 = vld [vmem:[#allocation8 + $0x30c] sm:$0xf0]  ;;  %v2894_v36 = vor.u32 %v3939_v25, %v2893_v23  ;;  %1693 = vmatpush.bf16.msra.mxu0 %v2638_v31 }
  0x3d   :  { %v3261_v28 = vld [vmem:[#allocation8 + $0x4e0] sm:$0xf]  ;;  %v4031_v29 = vld [vmem:[#allocation8 + $0x4ec] sm:$0xf0]  ;;  %v3022_v39 = vor.u32 %v3971_v27, %v3021_v26  ;;  %1706 = vmatpush.bf16.msra.mxu1 %v2766_v35 }
  0x3e   :  { %v3389_v30 = vld [vmem:[#allocation8 + $0x5e0] sm:$0xf]  ;;  %v4063_v32 = vld [vmem:[#allocation8 + $0x5ec] sm:$0xf0]  ;;  %v3262_v40 = vor.u32 %v4031_v29, %v3261_v28  ;;  %1719 = vmatpush.bf16.msra.mxu2 %v2894_v36 }
  0x3f   :  { %v3517_v33 = vld [vmem:[#allocation8 + $0x6e0] sm:$0xf]  ;;  %v4095_v34 = vld [vmem:[#allocation8 + $0x6ec] sm:$0xf0]  ;;  %v3390_v41 = vor.u32 %v4063_v32, %v3389_v30  ;;  %1732 = vmatpush.bf16.msra.mxu3 %v3022_v39 }
  0x40   :  { %v3645_v37 = vld [vmem:[#allocation8 + $0x7e0] sm:$0xf]  ;;  %v4127_v38 = vld [vmem:[#allocation8 + $0x7ec] sm:$0xf0]  ;;  %v3518_v42 = vor.u32 %v4095_v34, %v3517_v33  ;;  %1738 = vmatpush.bf16.msrb.mxu0 %v3262_v40 }
  0x41   :  { %v3245_v43 = vld [vmem:[#allocation8 + $0x4c0] sm:$0xf]  ;;  %v4027_v44 = vld [vmem:[#allocation8 + $0x4cc] sm:$0xf0]  ;;  %v3646_v46 = vor.u32 %v4127_v38, %v3645_v37  ;;  %1751 = vmatpush.bf16.msrb.mxu1 %v3390_v41  ;;  %1720 = vmatmul.bf16.vlgmr.msra.gmra.mxu2 %v4422_v4 }
  0x42   :  { %v3373_v45 = vld [vmem:[#allocation8 + $0x5c0] sm:$0xf]  ;;  %v4059_v47 = vld [vmem:[#allocation8 + $0x5cc] sm:$0xf0]  ;;  %v3246_v52 = vor.u32 %v4027_v44, %v3245_v43  ;;  %1764 = vmatpush.bf16.msrb.mxu2 %v3518_v42  ;;  %1733 = vmatmul.bf16.vlgmr.msra.gmra.mxu3 %v4424_v6 }
  0x43   :  { %v3501_v48 = vld [vmem:[#allocation8 + $0x6c0] sm:$0xf]  ;;  %v4091_v49 = vld [vmem:[#allocation8 + $0x6cc] sm:$0xf0]  ;;  %v3374_v54 = vor.u32 %v4059_v47, %v3373_v45  ;;  %1777 = vmatpush.bf16.msrb.mxu3 %v3646_v46 }
  0x44   :  { %v3629_v50 = vld [vmem:[#allocation8 + $0x7c0] sm:$0xf]  ;;  %v4123_v51 = vld [vmem:[#allocation8 + $0x7cc] sm:$0xf0]  ;;  %v3502_v55 = vor.u32 %v4091_v49, %v3501_v48  ;;  %1739 = vmatpush.bf16.msrb.mxu0 %v3246_v52 }
  0x45   :  { %v3229_v53 = vld [vmem:[#allocation8 + $0x4a0] sm:$0xf]  ;;  %v4023_v56 = vld [vmem:[#allocation8 + $0x4ac] sm:$0xf0]  ;;  %v3630_v59 = vor.u32 %v4123_v51, %v3629_v50  ;;  %1752 = vmatpush.bf16.msrb.mxu1 %v3374_v54 }
  0x46   :  { %v3357_v57 = vld [vmem:[#allocation8 + $0x5a0] sm:$0xf]  ;;  %v4055_v60 = vld [vmem:[#allocation8 + $0x5ac] sm:$0xf0]  ;;  %v3230_v3 = vor.u32 %v4023_v56, %v3229_v53  ;;  %1765 = vmatpush.bf16.msrb.mxu2 %v3502_v55 }
  0x47   :  { %v3485_v61 = vld [vmem:[#allocation8 + $0x6a0] sm:$0xf]  ;;  %v4087_v62 = vld [vmem:[#allocation8 + $0x6ac] sm:$0xf0]  ;;  %v3358_v7 = vor.u32 %v4055_v60, %v3357_v57  ;;  %1778 = vmatpush.bf16.msrb.mxu3 %v3630_v59 }
  0x48   :  { %v3613_v1 = vld [vmem:[#allocation8 + $0x7a0] sm:$0xf]  ;;  %v4119_v2 = vld [vmem:[#allocation8 + $0x7ac] sm:$0xf0]  ;;  %v3486_v8 = vor.u32 %v4087_v62, %v3485_v61  ;;  %1740 = vmatpush.bf16.msrb.mxu0 %v3230_v3  ;;  %v121_v3 = vld [vmem:[#allocation5 + $0x18] sm:$0xff] }
  0x49   :  { %v118_v5 = vld [vmem:[#allocation5] sm:$0xff]  ;;  %v4019_v10 = vld [vmem:[#allocation8 + $0x48c] sm:$0xf0]  ;;  %v3614_v14 = vor.u32 %v4119_v2, %v3613_v1  ;;  %1753 = vmatpush.bf16.msrb.mxu1 %v3358_v7 }
  0x4a   :  { %v3213_v9 = vld [vmem:[#allocation8 + $0x480] sm:$0xf]  ;;  %v382_v12 = vunpack.c.l.b16 %v118_v5  ;;  %v383_v13 = vunpack.c.h.b16 %v118_v5  ;;  %v4051_v15 = vld [vmem:[#allocation8 + $0x58c] sm:$0xf0]  ;;  %1766 = vmatpush.bf16.msrb.mxu2 %v3486_v8 }
  0x4b   :  { %v3341_v11 = vld [vmem:[#allocation8 + $0x580] sm:$0xf]  ;;  %v4083_v17 = vld [vmem:[#allocation8 + $0x68c] sm:$0xf0]  ;;  %v3214_v22 = vor.u32 %v4019_v10, %v3213_v9  ;;  %1779 = vmatpush.bf16.msrb.mxu3 %v3614_v14  ;;  %v3901_v10 = vld [vmem:[#allocation8 + $0xe4] sm:$0xf] }
  0x4c   :  { %v3469_v16 = vld [vmem:[#allocation8 + $0x680] sm:$0xf]  ;;  %v4115_v19 = vld [vmem:[#allocation8 + $0x78c] sm:$0xf0]  ;;  %v4427_v20 = vpack.c.b16 %v382_v12, %v382_v12  ;;  %v4430_v21 = vpack.c.b16 %v383_v13, %v383_v13  ;;  %v3342_v23 = vor.u32 %v4051_v15, %v3341_v11  ;;  %v2751_v11 = vld [vmem:[#allocation8 + $0xf0] sm:$0xf0] }
  0x4d   :  { %v3597_v18 = vld [vmem:[#allocation8 + $0x780] sm:$0xf]  ;;  %v3470_v24 = vor.u32 %v4083_v17, %v3469_v16  ;;  %v4015_v26 = vld [vmem:[#allocation8 + $0x46c] sm:$0xf0]  ;;  %1741 = vmatpush.bf16.msrb.mxu0 %v3214_v22  ;;  %v3933_v12 = vld [vmem:[#allocation8 + $0x1e4] sm:$0xf]  ;;  %v388_v17 = vunpack.c.l.b16 %v121_v3 }
  0x4e   :  { %v3197_v25 = vld [vmem:[#allocation8 + $0x460] sm:$0xf]  ;;  %v3598_v28 = vor.u32 %v4115_v19, %v3597_v18  ;;  %v4047_v29 = vld [vmem:[#allocation8 + $0x56c] sm:$0xf0]  ;;  %1694 = vmatmul.bf16.vlgmr.msra.gmra.mxu0 %v4427_v20  ;;  %1707 = vmatmul.bf16.vlgmr.msra.gmra.mxu1 %v4430_v21  ;;  %v2879_v14 = vld [vmem:[#allocation8 + $0x1f0] sm:$0xf0] }
  0x4f   :  { %v3325_v27 = vld [vmem:[#allocation8 + $0x560] sm:$0xf]  ;;  %v4079_v31 = vld [vmem:[#allocation8 + $0x66c] sm:$0xf0]  ;;  %v3198_v34 = vor.u32 %v4015_v26, %v3197_v25  ;;  %1754 = vmatpush.bf16.msrb.mxu1 %v3342_v23  ;;  %1767 = vmatpush.bf16.msrb.mxu2 %v3470_v24  ;;  %v3965_v15 = vld [vmem:[#allocation8 + $0x2e4] sm:$0xf]  ;;  %v389_v25 = vunpack.c.h.b16 %v121_v3 }
  0x50   :  { %v3453_v30 = vld [vmem:[#allocation8 + $0x660] sm:$0xf]  ;;  %v4111_v33 = vld [vmem:[#allocation8 + $0x76c] sm:$0xf0]  ;;  %v3326_v35 = vor.u32 %v4047_v29, %v3325_v27  ;;  %1780 = vmatpush.bf16.msrb.mxu3 %v3598_v28  ;;  %v3007_v16 = vld [vmem:[#allocation8 + $0x2f0] sm:$0xf0]  ;;  %v2754_v27 = vor.u32 %v3901_v10, %v2751_v11  ;;  %v2882_v29 = vor.u32 %v3933_v12, %v2879_v14 }
  0x51   :  { %v3581_v32 = vld [vmem:[#allocation8 + $0x760] sm:$0xf]  ;;  %v3454_v36 = vor.u32 %v4079_v31, %v3453_v30  ;;  %v4011_v38 = vld [vmem:[#allocation8 + $0x44c] sm:$0xf0]  ;;  %1742 = vmatpush.bf16.msrb.mxu0 %v3198_v34  ;;  %v3997_v22 = vld [vmem:[#allocation8 + $0x3e4] sm:$0xf]  ;;  %v3010_v30 = vor.u32 %v3965_v15, %v3007_v16 }
  0x52   :  { %v3181_v37 = vld [vmem:[#allocation8 + $0x440] sm:$0xf]  ;;  %v3582_v40 = vor.u32 %v4111_v33, %v3581_v32  ;;  %v4043_v41 = vld [vmem:[#allocation8 + $0x54c] sm:$0xf0]  ;;  %v3135_v23 = vld [vmem:[#allocation8 + $0x3f0] sm:$0xf0] }
  0x53   :  { %v3309_v39 = vld [vmem:[#allocation8 + $0x540] sm:$0xf]  ;;  %v4075_v43 = vld [vmem:[#allocation8 + $0x64c] sm:$0xf0]  ;;  %v3182_v46 = vor.u32 %v4011_v38, %v3181_v37  ;;  %1755 = vmatpush.bf16.msrb.mxu1 %v3326_v35  ;;  %1768 = vmatpush.bf16.msrb.mxu2 %v3454_v36  ;;  %v3897_v31 = vld [vmem:[#allocation8 + $0xc4] sm:$0xf]  ;;  %v3138_v34 = vor.u32 %v3997_v22, %v3135_v23  ;;  %v4434_v38 = vpack.c.b16 %v388_v17, %v388_v17 }
  0x54   :  { %v3437_v42 = vld [vmem:[#allocation8 + $0x640] sm:$0xf]  ;;  %v4107_v45 = vld [vmem:[#allocation8 + $0x74c] sm:$0xf0]  ;;  %v3310_v47 = vor.u32 %v4043_v41, %v3309_v39  ;;  %1781 = vmatpush.bf16.msrb.mxu3 %v3582_v40  ;;  %v2735_v32 = vld [vmem:[#allocation8 + $0xd0] sm:$0xf0] }
  0x55   :  { %v3565_v44 = vld [vmem:[#allocation8 + $0x740] sm:$0xf]  ;;  %v3438_v48 = vor.u32 %v4075_v43, %v3437_v42  ;;  %v4007_v50 = vld [vmem:[#allocation8 + $0x42c] sm:$0xf0]  ;;  %1743 = vmatpush.bf16.msrb.mxu0 %v3182_v46  ;;  %v3929_v33 = vld [vmem:[#allocation8 + $0x1c4] sm:$0xf]  ;;  %v4438_v42 = vpack.c.b16 %v389_v25, %v389_v25  ;;  %v2738_v43 = vor.u32 %v3897_v31, %v2735_v32 }
  0x56   :  { %v3165_v49 = vld [vmem:[#allocation8 + $0x420] sm:$0xf]  ;;  %v3566_v52 = vor.u32 %v4107_v45, %v3565_v44  ;;  %v4039_v53 = vld [vmem:[#allocation8 + $0x52c] sm:$0xf0]  ;;  %v2863_v35 = vld [vmem:[#allocation8 + $0x1d0] sm:$0xf0] }
  0x57   :  { %v3293_v51 = vld [vmem:[#allocation8 + $0x520] sm:$0xf]  ;;  %v4071_v55 = vld [vmem:[#allocation8 + $0x62c] sm:$0xf0]  ;;  %v3166_v59 = vor.u32 %v4007_v50, %v3165_v49  ;;  %1756 = vmatpush.bf16.msrb.mxu1 %v3310_v47  ;;  %1769 = vmatpush.bf16.msrb.mxu2 %v3438_v48  ;;  %v3961_v36 = vld [vmem:[#allocation8 + $0x2c4] sm:$0xf]  ;;  %v2866_v45 = vor.u32 %v3929_v33, %v2863_v35 }
  0x58   :  { %v3421_v54 = vld [vmem:[#allocation8 + $0x620] sm:$0xf]  ;;  %v4103_v57 = vld [vmem:[#allocation8 + $0x72c] sm:$0xf0]  ;;  %v3294_v63 = vor.u32 %v4039_v53, %v3293_v51  ;;  %1782 = vmatpush.bf16.msrb.mxu3 %v3566_v52  ;;  %v2991_v37 = vld [vmem:[#allocation8 + $0x2d0] sm:$0xf0] }
  0x59   :  { %v3549_v56 = vld [vmem:[#allocation8 + $0x720] sm:$0xf]  ;;  %v4003_v60 = vld [vmem:[#allocation8 + $0x40c] sm:$0xf0]  ;;  %v3422_v0 = vor.u32 %v4071_v55, %v3421_v54  ;;  %1744 = vmatpush.bf16.msrb.mxu0 %v3166_v59  ;;  %v3993_v39 = vld [vmem:[#allocation8 + $0x3c4] sm:$0xf]  ;;  %v2994_v46 = vor.u32 %v3961_v36, %v2991_v37 }
  0x5a   :  { %v3149_v58 = vld [vmem:[#allocation8 + $0x400] sm:$0xf]  ;;  %v4035_v62 = vld [vmem:[#allocation8 + $0x50c] sm:$0xf0]  ;;  %v3550_v5 = vor.u32 %v4103_v57, %v3549_v56  ;;  %v3119_v40 = vld [vmem:[#allocation8 + $0x3d0] sm:$0xf0] }
  0x5b   :  { %v3277_v61 = vld [vmem:[#allocation8 + $0x500] sm:$0xf]  ;;  %v4067_v2 = vld [vmem:[#allocation8 + $0x60c] sm:$0xf0]  ;;  %v3150_v13 = vor.u32 %v4003_v60, %v3149_v58  ;;  %1757 = vmatpush.bf16.msrb.mxu1 %v3294_v63  ;;  %1770 = vmatpush.bf16.msrb.mxu2 %v3422_v0  ;;  %v3893_v47 = vld [vmem:[#allocation8 + $0xa4] sm:$0xf]  ;;  %v3122_v50 = vor.u32 %v3993_v39, %v3119_v40 }
  0x5c   :  { %v3405_v1 = vld [vmem:[#allocation8 + $0x600] sm:$0xf]  ;;  %v4099_v8 = vld [vmem:[#allocation8 + $0x70c] sm:$0xf0]  ;;  %v3278_v18 = vor.u32 %v4035_v62, %v3277_v61  ;;  %1783 = vmatpush.bf16.msrb.mxu3 %v3550_v5  ;;  %v2719_v48 = vld [vmem:[#allocation8 + $0xb0] sm:$0xf0] }
  0x5d   :  { %v3533_v7 = vld [vmem:[#allocation8 + $0x700] sm:$0xf]  ;;  %v120_v9 = vld [vmem:[#allocation5 + $0x10] sm:$0xff]  ;;  %v3406_v19 = vor.u32 %v4067_v2, %v3405_v1  ;;  %1745 = vmatpush.bf16.msrb.mxu0 %v3150_v13  ;;  %v3925_v49 = vld [vmem:[#allocation8 + $0x1a4] sm:$0xf]  ;;  %v2722_v56 = vor.u32 %v3893_v47, %v2719_v48 }
  0x5e   :  { %v386_v24 = vunpack.c.l.b16 %v120_v9  ;;  %v3534_v26 = vor.u32 %v4099_v8, %v3533_v7  ;;  %v387_v28 = vunpack.c.h.b16 %v120_v9  ;;  %v2847_v51 = vld [vmem:[#allocation8 + $0x1b0] sm:$0xf0]  ;;  %v3957_v52 = vld [vmem:[#allocation8 + $0x2a4] sm:$0xf] }
  0x5f   :  { %1758 = vmatpush.bf16.msrb.mxu1 %v3278_v18  ;;  %1771 = vmatpush.bf16.msrb.mxu2 %v3406_v19  ;;  %v2975_v53 = vld [vmem:[#allocation8 + $0x2b0] sm:$0xf0]  ;;  %v3989_v54 = vld [vmem:[#allocation8 + $0x3a4] sm:$0xf]  ;;  %v2850_v57 = vor.u32 %v3925_v49, %v2847_v51 }
  0x60   :  { %v4436_v41 = vpack.c.b16 %v386_v24, %v386_v24  ;;  %1784 = vmatpush.bf16.msrb.mxu3 %v3534_v26  ;;  %v4440_v44 = vpack.c.b16 %v387_v28, %v387_v28  ;;  %v3103_v55 = vld [vmem:[#allocation8 + $0x3b0] sm:$0xf0]  ;;  %v2978_v58 = vor.u32 %v3957_v52, %v2975_v53  ;;  %v3889_v59 = vld [vmem:[#allocation8 + $0x84] sm:$0xf] }
  0x61   :  { %1790 = vmatpush.bf16.msra.mxu0 %v2754_v27  ;;  %v2703_v60 = vld [vmem:[#allocation8 + $0x90] sm:$0xf0]  ;;  %v3921_v61 = vld [vmem:[#allocation8 + $0x184] sm:$0xf]  ;;  %v3106_v62 = vor.u32 %v3989_v54, %v3103_v55 }
  0x62   :  { %1772 = vmatmul.bf16.vlgmr.msrb.gmra.mxu2 %v4434_v38  ;;  %1746 = vmatmul.bf16.vlgmr.msrb.gmra.mxu0 %v4436_v41  ;;  %v2831_v63 = vld [vmem:[#allocation8 + $0x190] sm:$0xf0]  ;;  %v3953_v0 = vld [vmem:[#allocation8 + $0x284] sm:$0xf]  ;;  %v2706_v5 = vor.u32 %v3889_v59, %v2703_v60 }
  0x63   :  { %1803 = vmatpush.bf16.msra.mxu1 %v2882_v29  ;;  %1816 = vmatpush.bf16.msra.mxu2 %v3010_v30  ;;  %v2959_v1 = vld [vmem:[#allocation8 + $0x290] sm:$0xf0]  ;;  %v3985_v2 = vld [vmem:[#allocation8 + $0x384] sm:$0xf]  ;;  %v2834_v7 = vor.u32 %v3921_v61, %v2831_v63 }
  0x64   :  { %1829 = vmatpush.bf16.msra.mxu3 %v3138_v34  ;;  %1759 = vmatmul.bf16.vlgmr.msrb.gmra.mxu1 %v4440_v44  ;;  %v3087_v3 = vld [vmem:[#allocation8 + $0x390] sm:$0xf0]  ;;  %v2962_v8 = vor.u32 %v3953_v0, %v2959_v1  ;;  %v3885_v9 = vld [vmem:[#allocation8 + $0x64] sm:$0xf] }
  0x65   :  { %1785 = vmatmul.bf16.vlgmr.msrb.gmra.mxu3 %v4438_v42  ;;  %1791 = vmatpush.bf16.msra.mxu0 %v2738_v43  ;;  %v2687_v10 = vld [vmem:[#allocation8 + $0x70] sm:$0xf0]  ;;  %v3917_v11 = vld [vmem:[#allocation8 + $0x164] sm:$0xf]  ;;  %v3090_v12 = vor.u32 %v3985_v2, %v3087_v3 }
  0x66   :  { %v2815_v13 = vld [vmem:[#allocation8 + $0x170] sm:$0xf0]  ;;  %v3949_v14 = vld [vmem:[#allocation8 + $0x264] sm:$0xf]  ;;  %v2690_v18 = vor.u32 %v3885_v9, %v2687_v10 }
  0x67   :  { %1804 = vmatpush.bf16.msra.mxu1 %v2866_v45  ;;  %1817 = vmatpush.bf16.msra.mxu2 %v2994_v46  ;;  %v2943_v15 = vld [vmem:[#allocation8 + $0x270] sm:$0xf0]  ;;  %v3981_v16 = vld [vmem:[#allocation8 + $0x364] sm:$0xf]  ;;  %v2818_v19 = vor.u32 %v3917_v11, %v2815_v13 }
  0x68   :  { %1830 = vmatpush.bf16.msra.mxu3 %v3122_v50  ;;  %v3071_v17 = vld [vmem:[#allocation8 + $0x370] sm:$0xf0]  ;;  %v2946_v22 = vor.u32 %v3949_v14, %v2943_v15  ;;  %v3881_v23 = vld [vmem:[#allocation8 + $0x44] sm:$0xf] }
  0x69   :  { %1792 = vmatpush.bf16.msra.mxu0 %v2722_v56  ;;  %v2671_v24 = vld [vmem:[#allocation8 + $0x50] sm:$0xf0]  ;;  %v3913_v25 = vld [vmem:[#allocation8 + $0x144] sm:$0xf]  ;;  %v3074_v26 = vor.u32 %v3981_v16, %v3071_v17 }
  0x6a   :  { %v2799_v27 = vld [vmem:[#allocation8 + $0x150] sm:$0xf0]  ;;  %v3945_v28 = vld [vmem:[#allocation8 + $0x244] sm:$0xf]  ;;  %v2674_v32 = vor.u32 %v3881_v23, %v2671_v24 }
  0x6b   :  { %1805 = vmatpush.bf16.msra.mxu1 %v2850_v57  ;;  %1818 = vmatpush.bf16.msra.mxu2 %v2978_v58  ;;  %v2927_v29 = vld [vmem:[#allocation8 + $0x250] sm:$0xf0]  ;;  %v3977_v30 = vld [vmem:[#allocation8 + $0x344] sm:$0xf]  ;;  %v2802_v33 = vor.u32 %v3913_v25, %v2799_v27 }
  0x6c   :  { %1831 = vmatpush.bf16.msra.mxu3 %v3106_v62  ;;  %v3055_v31 = vld [vmem:[#allocation8 + $0x350] sm:$0xf0]  ;;  %v2930_v34 = vor.u32 %v3945_v28, %v2927_v29  ;;  %v3877_v35 = vld [vmem:[#allocation8 + $0x24] sm:$0xf] }
  0x6d   :  { %1793 = vmatpush.bf16.msra.mxu0 %v2706_v5  ;;  %v2655_v36 = vld [vmem:[#allocation8 + $0x30] sm:$0xf0]  ;;  %v3909_v37 = vld [vmem:[#allocation8 + $0x124] sm:$0xf]  ;;  %v3058_v39 = vor.u32 %v3977_v30, %v3055_v31 }
  0x6e   :  { %v2783_v40 = vld [vmem:[#allocation8 + $0x130] sm:$0xf0]  ;;  %v3941_v43 = vld [vmem:[#allocation8 + $0x224] sm:$0xf]  ;;  %v2658_v48 = vor.u32 %v3877_v35, %v2655_v36 }
  0x6f   :  { %1806 = vmatpush.bf16.msra.mxu1 %v2834_v7  ;;  %1819 = vmatpush.bf16.msra.mxu2 %v2962_v8  ;;  %v2911_v45 = vld [vmem:[#allocation8 + $0x230] sm:$0xf0]  ;;  %v3973_v46 = vld [vmem:[#allocation8 + $0x324] sm:$0xf]  ;;  %v2786_v51 = vor.u32 %v3909_v37, %v2783_v40 }
  0x70   :  { %1832 = vmatpush.bf16.msra.mxu3 %v3090_v12  ;;  %v3039_v47 = vld [vmem:[#allocation8 + $0x330] sm:$0xf0]  ;;  %v3873_v49 = vld [vmem:[#allocation8 + $0x4] sm:$0xf]  ;;  %v2914_v52 = vor.u32 %v3941_v43, %v2911_v45 }
  0x71   :  { %1794 = vmatpush.bf16.msra.mxu0 %v2690_v18  ;;  %v2639_v50 = vld [vmem:[#allocation8 + $0x10] sm:$0xf0]  ;;  %v3905_v53 = vld [vmem:[#allocation8 + $0x104] sm:$0xf]  ;;  %v3042_v56 = vor.u32 %v3973_v46, %v3039_v47 }
  0x72   :  { %v2767_v54 = vld [vmem:[#allocation8 + $0x110] sm:$0xf0]  ;;  %v3937_v55 = vld [vmem:[#allocation8 + $0x204] sm:$0xf]  ;;  %v2642_v63 = vor.u32 %v3873_v49, %v2639_v50 }
  0x73   :  { %1807 = vmatpush.bf16.msra.mxu1 %v2818_v19  ;;  %1820 = vmatpush.bf16.msra.mxu2 %v2946_v22  ;;  %v2895_v57 = vld [vmem:[#allocation8 + $0x210] sm:$0xf0]  ;;  %v3969_v58 = vld [vmem:[#allocation8 + $0x304] sm:$0xf]  ;;  %v2770_v3 = vor.u32 %v3905_v53, %v2767_v54 }
  0x74   :  { %1833 = vmatpush.bf16.msra.mxu3 %v3074_v26  ;;  %v3023_v59 = vld [vmem:[#allocation8 + $0x310] sm:$0xf0]  ;;  %v4029_v60 = vld [vmem:[#allocation8 + $0x4e4] sm:$0xf]  ;;  %v2898_v5 = vor.u32 %v3937_v55, %v2895_v57 }
  0x75   :  { %1795 = vmatpush.bf16.msra.mxu0 %v2674_v32  ;;  %v3263_v61 = vld [vmem:[#allocation8 + $0x4f0] sm:$0xf0]  ;;  %v4061_v62 = vld [vmem:[#allocation8 + $0x5e4] sm:$0xf]  ;;  %v3026_v9 = vor.u32 %v3969_v58, %v3023_v59 }
  0x76   :  { %v3391_v0 = vld [vmem:[#allocation8 + $0x5f0] sm:$0xf0]  ;;  %v4093_v1 = vld [vmem:[#allocation8 + $0x6e4] sm:$0xf]  ;;  %v3266_v10 = vor.u32 %v4029_v60, %v3263_v61 }
  0x77   :  { %1808 = vmatpush.bf16.msra.mxu1 %v2802_v33  ;;  %1821 = vmatpush.bf16.msra.mxu2 %v2930_v34  ;;  %v3519_v2 = vld [vmem:[#allocation8 + $0x6f0] sm:$0xf0]  ;;  %v4125_v7 = vld [vmem:[#allocation8 + $0x7e4] sm:$0xf]  ;;  %v3394_v11 = vor.u32 %v4061_v62, %v3391_v0 }
  0x78   :  { %1834 = vmatpush.bf16.msra.mxu3 %v3058_v39  ;;  %v3647_v8 = vld [vmem:[#allocation8 + $0x7f0] sm:$0xf0]  ;;  %v3522_v12 = vor.u32 %v4093_v1, %v3519_v2  ;;  %v4025_v13 = vld [vmem:[#allocation8 + $0x4c4] sm:$0xf] }
  0x79   :  { %1796 = vmatpush.bf16.msra.mxu0 %v2658_v48  ;;  %v3247_v14 = vld [vmem:[#allocation8 + $0x4d0] sm:$0xf0]  ;;  %v4057_v15 = vld [vmem:[#allocation8 + $0x5c4] sm:$0xf]  ;;  %v3650_v16 = vor.u32 %v4125_v7, %v3647_v8 }
  0x7a   :  { %v3375_v17 = vld [vmem:[#allocation8 + $0x5d0] sm:$0xf0]  ;;  %v4089_v18 = vld [vmem:[#allocation8 + $0x6c4] sm:$0xf]  ;;  %v3250_v24 = vor.u32 %v4025_v13, %v3247_v14 }
  0x7b   :  { %1809 = vmatpush.bf16.msra.mxu1 %v2786_v51  ;;  %1822 = vmatpush.bf16.msra.mxu2 %v2914_v52  ;;  %v3503_v19 = vld [vmem:[#allocation8 + $0x6d0] sm:$0xf0]  ;;  %v4121_v22 = vld [vmem:[#allocation8 + $0x7c4] sm:$0xf]  ;;  %v3378_v25 = vor.u32 %v4057_v15, %v3375_v17 }
  0x7c   :  { %1835 = vmatpush.bf16.msra.mxu3 %v3042_v56  ;;  %v3631_v23 = vld [vmem:[#allocation8 + $0x7d0] sm:$0xf0]  ;;  %v3506_v26 = vor.u32 %v4089_v18, %v3503_v19  ;;  %v4021_v27 = vld [vmem:[#allocation8 + $0x4a4] sm:$0xf] }
  0x7d   :  { %1797 = vmatpush.bf16.msra.mxu0 %v2642_v63  ;;  %v3231_v28 = vld [vmem:[#allocation8 + $0x4b0] sm:$0xf0]  ;;  %v4053_v29 = vld [vmem:[#allocation8 + $0x5a4] sm:$0xf]  ;;  %v3634_v30 = vor.u32 %v4121_v22, %v3631_v23 }
  0x7e   :  { %v3359_v31 = vld [vmem:[#allocation8 + $0x5b0] sm:$0xf0]  ;;  %v4085_v32 = vld [vmem:[#allocation8 + $0x6a4] sm:$0xf]  ;;  %v3234_v36 = vor.u32 %v4021_v27, %v3231_v28 }
  0x7f   :  { %1810 = vmatpush.bf16.msra.mxu1 %v2770_v3  ;;  %1823 = vmatpush.bf16.msra.mxu2 %v2898_v5  ;;  %v3487_v33 = vld [vmem:[#allocation8 + $0x6b0] sm:$0xf0]  ;;  %v4117_v34 = vld [vmem:[#allocation8 + $0x7a4] sm:$0xf]  ;;  %v3362_v37 = vor.u32 %v4053_v29, %v3359_v31 }
  0x80   :  { %1836 = vmatpush.bf16.msra.mxu3 %v3026_v9  ;;  %v3615_v35 = vld [vmem:[#allocation8 + $0x7b0] sm:$0xf0]  ;;  %1798 = vmatmul.bf16.vlgmr.msra.gmra.mxu0 %v4427_v20  ;;  %v3490_v39 = vor.u32 %v4085_v32, %v3487_v33  ;;  %v4017_v40 = vld [vmem:[#allocation8 + $0x484] sm:$0xf] }
  0x81   :  { %1842 = vmatpush.bf16.msrb.mxu0 %v3266_v10  ;;  %v3215_v43 = vld [vmem:[#allocation8 + $0x490] sm:$0xf0]  ;;  %v4049_v45 = vld [vmem:[#allocation8 + $0x584] sm:$0xf]  ;;  %v3618_v46 = vor.u32 %v4117_v34, %v3615_v35 }
  0x82   :  { %1824 = vmatmul.bf16.vlgmr.msra.gmra.mxu2 %v4422_v4  ;;  %1811 = vmatmul.bf16.vlgmr.msra.gmra.mxu1 %v4430_v21  ;;  %v3343_v47 = vld [vmem:[#allocation8 + $0x590] sm:$0xf0]  ;;  %v4081_v48 = vld [vmem:[#allocation8 + $0x684] sm:$0xf]  ;;  %v3218_v52 = vor.u32 %v4017_v40, %v3215_v43  ;;  %v2757_v43 = vld [vmem:[#allocation8 + $0xe8] sm:$0xf] }
  0x83   :  { %1855 = vmatpush.bf16.msrb.mxu1 %v3394_v11  ;;  %1868 = vmatpush.bf16.msrb.mxu2 %v3522_v12  ;;  %v3471_v49 = vld [vmem:[#allocation8 + $0x690] sm:$0xf0]  ;;  %v4113_v50 = vld [vmem:[#allocation8 + $0x784] sm:$0xf]  ;;  %v3346_v53 = vor.u32 %v4049_v45, %v3343_v47  ;;  %v3904_v45 = vld [vmem:[#allocation8 + $0xf4] sm:$0xf0] }
  0x84   :  { %1881 = vmatpush.bf16.msrb.mxu3 %v3650_v16  ;;  %v3599_v51 = vld [vmem:[#allocation8 + $0x790] sm:$0xf0]  ;;  %v3474_v54 = vor.u32 %v4081_v48, %v3471_v49  ;;  %v4013_v55 = vld [vmem:[#allocation8 + $0x464] sm:$0xf]  ;;  %v3936_v48 = vld [vmem:[#allocation8 + $0x1f4] sm:$0xf0] }
  0x85   :  { %1837 = vmatmul.bf16.vlgmr.msra.gmra.mxu3 %v4424_v6  ;;  %1843 = vmatpush.bf16.msrb.mxu0 %v3250_v24  ;;  %v3199_v56 = vld [vmem:[#allocation8 + $0x470] sm:$0xf0]  ;;  %v4045_v57 = vld [vmem:[#allocation8 + $0x564] sm:$0xf]  ;;  %v3602_v58 = vor.u32 %v4113_v50, %v3599_v51  ;;  %v3013_v49 = vld [vmem:[#allocation8 + $0x2e8] sm:$0xf] }
  0x86   :  { %v3327_v59 = vld [vmem:[#allocation8 + $0x570] sm:$0xf0]  ;;  %v4077_v60 = vld [vmem:[#allocation8 + $0x664] sm:$0xf]  ;;  %v3202_v0 = vor.u32 %v4013_v55, %v3199_v56  ;;  %v3968_v50 = vld [vmem:[#allocation8 + $0x2f4] sm:$0xf0]  ;;  %v2758_v56 = vor.u32 %v3904_v45, %v2757_v43 }
  0x87   :  { %1856 = vmatpush.bf16.msrb.mxu1 %v3378_v25  ;;  %1869 = vmatpush.bf16.msrb.mxu2 %v3506_v26  ;;  %v3455_v61 = vld [vmem:[#allocation8 + $0x670] sm:$0xf0]  ;;  %v4109_v62 = vld [vmem:[#allocation8 + $0x764] sm:$0xf]  ;;  %v3330_v1 = vor.u32 %v4045_v57, %v3327_v59  ;;  %v2741_v59 = vld [vmem:[#allocation8 + $0xc8] sm:$0xf] }
  0x88   :  { %1882 = vmatpush.bf16.msrb.mxu3 %v3634_v30  ;;  %v3583_v63 = vld [vmem:[#allocation8 + $0x770] sm:$0xf0]  ;;  %v3458_v2 = vor.u32 %v4077_v60, %v3455_v61  ;;  %v4009_v3 = vld [vmem:[#allocation8 + $0x444] sm:$0xf]  ;;  %v3900_v60 = vld [vmem:[#allocation8 + $0xd4] sm:$0xf0] }
  0x89   :  { %1844 = vmatpush.bf16.msrb.mxu0 %v3234_v36  ;;  %v3183_v5 = vld [vmem:[#allocation8 + $0x450] sm:$0xf0]  ;;  %v4041_v7 = vld [vmem:[#allocation8 + $0x544] sm:$0xf]  ;;  %v3586_v8 = vor.u32 %v4109_v62, %v3583_v63  ;;  %v2869_v61 = vld [vmem:[#allocation8 + $0x1c8] sm:$0xf] }
  0x8a   :  { %v3311_v9 = vld [vmem:[#allocation8 + $0x550] sm:$0xf0]  ;;  %v4073_v10 = vld [vmem:[#allocation8 + $0x644] sm:$0xf]  ;;  %v3186_v14 = vor.u32 %v4009_v3, %v3183_v5  ;;  %v3932_v63 = vld [vmem:[#allocation8 + $0x1d4] sm:$0xf0]  ;;  %v2742_v5 = vor.u32 %v3900_v60, %v2741_v59 }
  0x8b   :  { %1857 = vmatpush.bf16.msrb.mxu1 %v3362_v37  ;;  %1870 = vmatpush.bf16.msrb.mxu2 %v3490_v39  ;;  %v3439_v11 = vld [vmem:[#allocation8 + $0x650] sm:$0xf0]  ;;  %v4105_v12 = vld [vmem:[#allocation8 + $0x744] sm:$0xf]  ;;  %v3314_v15 = vor.u32 %v4041_v7, %v3311_v9  ;;  %v3996_v3 = vld [vmem:[#allocation8 + $0x3d4] sm:$0xf0]  ;;  %v2870_v7 = vor.u32 %v3932_v63, %v2869_v61 }
  0x8c   :  { %1883 = vmatpush.bf16.msrb.mxu3 %v3618_v46  ;;  %v3567_v13 = vld [vmem:[#allocation8 + $0x750] sm:$0xf0]  ;;  %v3442_v16 = vor.u32 %v4073_v10, %v3439_v11  ;;  %v4005_v17 = vld [vmem:[#allocation8 + $0x424] sm:$0xf]  ;;  %v2885_v46 = vld [vmem:[#allocation8 + $0x1e8] sm:$0xf] }
  0x8d   :  { %1845 = vmatpush.bf16.msrb.mxu0 %v3218_v52  ;;  %v3167_v18 = vld [vmem:[#allocation8 + $0x430] sm:$0xf0]  ;;  %v4037_v19 = vld [vmem:[#allocation8 + $0x524] sm:$0xf]  ;;  %v3570_v22 = vor.u32 %v4105_v12, %v3567_v13  ;;  %v2886_v57 = vor.u32 %v3936_v48, %v2885_v46  ;;  %v2725_v9 = vld [vmem:[#allocation8 + $0xa8] sm:$0xf] }
  0x8e   :  { %v3295_v23 = vld [vmem:[#allocation8 + $0x530] sm:$0xf0]  ;;  %v4069_v24 = vld [vmem:[#allocation8 + $0x624] sm:$0xf]  ;;  %v3170_v28 = vor.u32 %v4005_v17, %v3167_v18  ;;  %v3896_v10 = vld [vmem:[#allocation8 + $0xb4] sm:$0xf0] }
  0x8f   :  { %1858 = vmatpush.bf16.msrb.mxu1 %v3346_v53  ;;  %1871 = vmatpush.bf16.msrb.mxu2 %v3474_v54  ;;  %v3423_v25 = vld [vmem:[#allocation8 + $0x630] sm:$0xf0]  ;;  %v4101_v26 = vld [vmem:[#allocation8 + $0x724] sm:$0xf]  ;;  %v3298_v31 = vor.u32 %v4037_v19, %v3295_v23  ;;  %v3141_v53 = vld [vmem:[#allocation8 + $0x3e8] sm:$0xf]  ;;  %v2726_v18 = vor.u32 %v3896_v10, %v2725_v9 }
  0x90   :  { %1884 = vmatpush.bf16.msrb.mxu3 %v3602_v58  ;;  %v3551_v27 = vld [vmem:[#allocation8 + $0x730] sm:$0xf0]  ;;  %v4001_v29 = vld [vmem:[#allocation8 + $0x404] sm:$0xf]  ;;  %v3426_v32 = vor.u32 %v4069_v24, %v3423_v25  ;;  %v4000_v54 = vld [vmem:[#allocation8 + $0x3f4] sm:$0xf0]  ;;  %v3014_v58 = vor.u32 %v3968_v50, %v3013_v49 }
  0x91   :  { %1846 = vmatpush.bf16.msrb.mxu0 %v3202_v0  ;;  %v3151_v30 = vld [vmem:[#allocation8 + $0x410] sm:$0xf0]  ;;  %v4033_v33 = vld [vmem:[#allocation8 + $0x504] sm:$0xf]  ;;  %v3554_v36 = vor.u32 %v4101_v26, %v3551_v27  ;;  %v3142_v62 = vor.u32 %v4000_v54, %v3141_v53  ;;  %v2997_v0 = vld [vmem:[#allocation8 + $0x2c8] sm:$0xf] }
  0x92   :  { %v3279_v34 = vld [vmem:[#allocation8 + $0x510] sm:$0xf0]  ;;  %v4065_v35 = vld [vmem:[#allocation8 + $0x604] sm:$0xf]  ;;  %v3154_v47 = vor.u32 %v4001_v29, %v3151_v30  ;;  %v2853_v11 = vld [vmem:[#allocation8 + $0x1a8] sm:$0xf] }
  0x93   :  { %1859 = vmatpush.bf16.msrb.mxu1 %v3330_v1  ;;  %1872 = vmatpush.bf16.msrb.mxu2 %v3458_v2  ;;  %v3407_v37 = vld [vmem:[#allocation8 + $0x610] sm:$0xf0]  ;;  %v4097_v39 = vld [vmem:[#allocation8 + $0x704] sm:$0xf]  ;;  %v3282_v51 = vor.u32 %v4033_v33, %v3279_v34  ;;  %v3964_v1 = vld [vmem:[#allocation8 + $0x2d4] sm:$0xf0] }
  0x94   :  { %1885 = vmatpush.bf16.msrb.mxu3 %v3586_v8  ;;  %v3535_v40 = vld [vmem:[#allocation8 + $0x710] sm:$0xf0]  ;;  %v3410_v52 = vor.u32 %v4065_v35, %v3407_v37  ;;  %v3125_v2 = vld [vmem:[#allocation8 + $0x3c8] sm:$0xf]  ;;  %v2998_v8 = vor.u32 %v3964_v1, %v2997_v0  ;;  %v3928_v13 = vld [vmem:[#allocation8 + $0x1b4] sm:$0xf0] }
  0x95   :  { %1847 = vmatpush.bf16.msrb.mxu0 %v3186_v14  ;;  %v3538_v55 = vor.u32 %v4097_v39, %v3535_v40  ;;  %v3126_v12 = vor.u32 %v3996_v3, %v3125_v2  ;;  %v2981_v14 = vld [vmem:[#allocation8 + $0x2a8] sm:$0xf]  ;;  %v3992_v17 = vld [vmem:[#allocation8 + $0x3b4] sm:$0xf0]  ;;  %v2854_v19 = vor.u32 %v3928_v13, %v2853_v11 }
  0x96   :  { %v2709_v23 = vld [vmem:[#allocation8 + $0x88] sm:$0xf]  ;;  %v3892_v24 = vld [vmem:[#allocation8 + $0x94] sm:$0xf0] }
  0x97   :  { %1860 = vmatpush.bf16.msrb.mxu1 %v3314_v15  ;;  %1873 = vmatpush.bf16.msrb.mxu2 %v3442_v16  ;;  %v3960_v15 = vld [vmem:[#allocation8 + $0x2b4] sm:$0xf0]  ;;  %v3109_v16 = vld [vmem:[#allocation8 + $0x3a8] sm:$0xf] }
  0x98   :  { %1886 = vmatpush.bf16.msrb.mxu3 %v3570_v22  ;;  %v2982_v22 = vor.u32 %v3960_v15, %v2981_v14  ;;  %v2837_v25 = vld [vmem:[#allocation8 + $0x188] sm:$0xf]  ;;  %v3110_v26 = vor.u32 %v3992_v17, %v3109_v16  ;;  %v3924_v27 = vld [vmem:[#allocation8 + $0x194] sm:$0xf0] }
  0x99   :  { %1848 = vmatpush.bf16.msrb.mxu0 %v3170_v28  ;;  %v2965_v28 = vld [vmem:[#allocation8 + $0x288] sm:$0xf]  ;;  %v3956_v29 = vld [vmem:[#allocation8 + $0x294] sm:$0xf0]  ;;  %v2838_v33 = vor.u32 %v3924_v27, %v2837_v25 }
  0x9a   :  { %v3093_v30 = vld [vmem:[#allocation8 + $0x388] sm:$0xf]  ;;  %v2966_v34 = vor.u32 %v3956_v29, %v2965_v28  ;;  %v3920_v40 = vld [vmem:[#allocation8 + $0x174] sm:$0xf0] }
  0x9b   :  { %1861 = vmatpush.bf16.msrb.mxu1 %v3298_v31  ;;  %1874 = vmatpush.bf16.msrb.mxu2 %v3426_v32  ;;  %v3988_v31 = vld [vmem:[#allocation8 + $0x394] sm:$0xf0]  ;;  %v2710_v32 = vor.u32 %v3892_v24, %v2709_v23  ;;  %v2693_v35 = vld [vmem:[#allocation8 + $0x68] sm:$0xf] }
  0x9c   :  { %1887 = vmatpush.bf16.msrb.mxu3 %v3554_v36  ;;  %v3888_v36 = vld [vmem:[#allocation8 + $0x74] sm:$0xf0]  ;;  %v2821_v37 = vld [vmem:[#allocation8 + $0x168] sm:$0xf]  ;;  %v3094_v39 = vor.u32 %v3988_v31, %v3093_v30 }
  0x9d   :  { %1849 = vmatpush.bf16.msrb.mxu0 %v3154_v47  ;;  %v2949_v43 = vld [vmem:[#allocation8 + $0x268] sm:$0xf]  ;;  %v3952_v45 = vld [vmem:[#allocation8 + $0x274] sm:$0xf0]  ;;  %v2694_v48 = vor.u32 %v3888_v36, %v2693_v35  ;;  %v2822_v49 = vor.u32 %v3920_v40, %v2821_v37 }
  0x9e   :  { %v3077_v46 = vld [vmem:[#allocation8 + $0x368] sm:$0xf]  ;;  %v3984_v47 = vld [vmem:[#allocation8 + $0x374] sm:$0xf0]  ;;  %v2950_v50 = vor.u32 %v3952_v45, %v2949_v43 }
  0x9f   :  { %1862 = vmatpush.bf16.msrb.mxu1 %v3282_v51  ;;  %1875 = vmatpush.bf16.msrb.mxu2 %v3410_v52  ;;  %v2677_v51 = vld [vmem:[#allocation8 + $0x48] sm:$0xf]  ;;  %v3884_v52 = vld [vmem:[#allocation8 + $0x54] sm:$0xf0]  ;;  %v3078_v54 = vor.u32 %v3984_v47, %v3077_v46 }
  0xa0   :  { %1888 = vmatpush.bf16.msrb.mxu3 %v3538_v55  ;;  %1850 = vmatmul.bf16.vlgmr.msrb.gmra.mxu0 %v4436_v41  ;;  %v2805_v53 = vld [vmem:[#allocation8 + $0x148] sm:$0xf]  ;;  %v3916_v55 = vld [vmem:[#allocation8 + $0x154] sm:$0xf0]  ;;  %v2678_v60 = vor.u32 %v3884_v52, %v2677_v51 }
  0xa1   :  { %1894 = vmatpush.bf16.msra.mxu0 %v2758_v56  ;;  %v2933_v56 = vld [vmem:[#allocation8 + $0x248] sm:$0xf]  ;;  %v3980_v59 = vld [vmem:[#allocation8 + $0x354] sm:$0xf0]  ;;  %v2806_v61 = vor.u32 %v3916_v55, %v2805_v53 }
  0xa2   :  { %1876 = vmatmul.bf16.vlgmr.msrb.gmra.mxu2 %v4434_v38  ;;  %1863 = vmatmul.bf16.vlgmr.msrb.gmra.mxu1 %v4440_v44  ;;  %v2661_v63 = vld [vmem:[#allocation8 + $0x28] sm:$0xf]  ;;  %v3880_v0 = vld [vmem:[#allocation8 + $0x34] sm:$0xf0] }
  0xa3   :  { %1907 = vmatpush.bf16.msra.mxu1 %v2886_v57  ;;  %1920 = vmatpush.bf16.msra.mxu2 %v3014_v58  ;;  %v3948_v57 = vld [vmem:[#allocation8 + $0x254] sm:$0xf0]  ;;  %v3061_v58 = vld [vmem:[#allocation8 + $0x348] sm:$0xf]  ;;  %v2662_v10 = vor.u32 %v3880_v0, %v2661_v63 }
  0xa4   :  { %1933 = vmatpush.bf16.msra.mxu3 %v3142_v62  ;;  %v2934_v62 = vor.u32 %v3948_v57, %v2933_v56  ;;  %v2789_v1 = vld [vmem:[#allocation8 + $0x128] sm:$0xf]  ;;  %v3062_v2 = vor.u32 %v3980_v59, %v3061_v58  ;;  %v3912_v3 = vld [vmem:[#allocation8 + $0x134] sm:$0xf0] }
  0xa5   :  { %1889 = vmatmul.bf16.vlgmr.msrb.gmra.mxu3 %v4438_v42  ;;  %1895 = vmatpush.bf16.msra.mxu0 %v2742_v5  ;;  %v2917_v5 = vld [vmem:[#allocation8 + $0x228] sm:$0xf]  ;;  %v3976_v9 = vld [vmem:[#allocation8 + $0x334] sm:$0xf0]  ;;  %v2790_v13 = vor.u32 %v3912_v3, %v2789_v1 }
  0xa6   :  { %v2645_v11 = vld [vmem:[#allocation8 + $0x8] sm:$0xf]  ;;  %v3908_v16 = vld [vmem:[#allocation8 + $0x114] sm:$0xf0] }
  0xa7   :  { %1908 = vmatpush.bf16.msra.mxu1 %v2870_v7  ;;  %1921 = vmatpush.bf16.msra.mxu2 %v2998_v8  ;;  %v3944_v7 = vld [vmem:[#allocation8 + $0x234] sm:$0xf0]  ;;  %v3045_v8 = vld [vmem:[#allocation8 + $0x328] sm:$0xf] }
  0xa8   :  { %1934 = vmatpush.bf16.msra.mxu3 %v3126_v12  ;;  %v3876_v12 = vld [vmem:[#allocation8 + $0x14] sm:$0xf0]  ;;  %v2918_v14 = vor.u32 %v3944_v7, %v2917_v5  ;;  %v2773_v15 = vld [vmem:[#allocation8 + $0x108] sm:$0xf] }
  0xa9   :  { %1896 = vmatpush.bf16.msra.mxu0 %v2726_v18  ;;  %v2901_v17 = vld [vmem:[#allocation8 + $0x208] sm:$0xf]  ;;  %v3046_v18 = vor.u32 %v3976_v9, %v3045_v8  ;;  %v3972_v23 = vld [vmem:[#allocation8 + $0x314] sm:$0xf0]  ;;  %v2646_v27 = vor.u32 %v3876_v12, %v2645_v11  ;;  %v2774_v31 = vor.u32 %v3908_v16, %v2773_v15 }
  0xaa   :  { %v3269_v24 = vld [vmem:[#allocation8 + $0x4e8] sm:$0xf]  ;;  %v4032_v25 = vld [vmem:[#allocation8 + $0x4f4] sm:$0xf0] }
  0xab   :  { %1909 = vmatpush.bf16.msra.mxu1 %v2854_v19  ;;  %1922 = vmatpush.bf16.msra.mxu2 %v2982_v22  ;;  %v3940_v19 = vld [vmem:[#allocation8 + $0x214] sm:$0xf0]  ;;  %v3029_v22 = vld [vmem:[#allocation8 + $0x308] sm:$0xf]  ;;  %v3270_v36 = vor.u32 %v4032_v25, %v3269_v24 }
  0xac   :  { %1935 = vmatpush.bf16.msra.mxu3 %v3110_v26  ;;  %v3397_v26 = vld [vmem:[#allocation8 + $0x5e8] sm:$0xf]  ;;  %v4064_v28 = vld [vmem:[#allocation8 + $0x5f4] sm:$0xf0]  ;;  %v3030_v35 = vor.u32 %v3972_v23, %v3029_v22 }
  0xad   :  { %1897 = vmatpush.bf16.msra.mxu0 %v2710_v32  ;;  %v3525_v29 = vld [vmem:[#allocation8 + $0x6e8] sm:$0xf]  ;;  %v4096_v30 = vld [vmem:[#allocation8 + $0x6f4] sm:$0xf0]  ;;  %v2902_v32 = vor.u32 %v3940_v19, %v2901_v17  ;;  %v3398_v37 = vor.u32 %v4064_v28, %v3397_v26 }
  0xae   :  { %v3253_v40 = vld [vmem:[#allocation8 + $0x4c8] sm:$0xf]  ;;  %v4028_v43 = vld [vmem:[#allocation8 + $0x4d4] sm:$0xf0] }
  0xaf   :  { %1910 = vmatpush.bf16.msra.mxu1 %v2838_v33  ;;  %1923 = vmatpush.bf16.msra.mxu2 %v2966_v34  ;;  %v3653_v33 = vld [vmem:[#allocation8 + $0x7e8] sm:$0xf]  ;;  %v4128_v34 = vld [vmem:[#allocation8 + $0x7f4] sm:$0xf0]  ;;  %v3254_v52 = vor.u32 %v4028_v43, %v3253_v40 }
  0xb0   :  { %1936 = vmatpush.bf16.msra.mxu3 %v3094_v39  ;;  %v3526_v39 = vor.u32 %v4096_v30, %v3525_v29  ;;  %v3381_v45 = vld [vmem:[#allocation8 + $0x5c8] sm:$0xf]  ;;  %v3654_v46 = vor.u32 %v4128_v34, %v3653_v33  ;;  %v4060_v47 = vld [vmem:[#allocation8 + $0x5d4] sm:$0xf0] }
  0xb1   :  { %1898 = vmatpush.bf16.msra.mxu0 %v2694_v48  ;;  %v3509_v48 = vld [vmem:[#allocation8 + $0x6c8] sm:$0xf]  ;;  %v4124_v51 = vld [vmem:[#allocation8 + $0x7d4] sm:$0xf0]  ;;  %v3382_v53 = vor.u32 %v4060_v47, %v3381_v45 }
  0xb2   :  { %v3237_v55 = vld [vmem:[#allocation8 + $0x4a8] sm:$0xf]  ;;  %v4024_v56 = vld [vmem:[#allocation8 + $0x4b4] sm:$0xf0] }
  0xb3   :  { %1911 = vmatpush.bf16.msra.mxu1 %v2822_v49  ;;  %1924 = vmatpush.bf16.msra.mxu2 %v2950_v50  ;;  %v4092_v49 = vld [vmem:[#allocation8 + $0x6d4] sm:$0xf0]  ;;  %v3637_v50 = vld [vmem:[#allocation8 + $0x7c8] sm:$0xf]  ;;  %v3238_v0 = vor.u32 %v4024_v56, %v3237_v55 }
  0xb4   :  { %1937 = vmatpush.bf16.msra.mxu3 %v3078_v54  ;;  %v3510_v54 = vor.u32 %v4092_v49, %v3509_v48  ;;  %v3365_v57 = vld [vmem:[#allocation8 + $0x5a8] sm:$0xf]  ;;  %v3638_v58 = vor.u32 %v4124_v51, %v3637_v50  ;;  %v4056_v59 = vld [vmem:[#allocation8 + $0x5b4] sm:$0xf0] }
  0xb5   :  { %1899 = vmatpush.bf16.msra.mxu0 %v2678_v60  ;;  %v3493_v60 = vld [vmem:[#allocation8 + $0x6a8] sm:$0xf]  ;;  %v4120_v63 = vld [vmem:[#allocation8 + $0x7b4] sm:$0xf0]  ;;  %v3366_v1 = vor.u32 %v4056_v59, %v3365_v57 }
  0xb6   :  { %v3221_v3 = vld [vmem:[#allocation8 + $0x488] sm:$0xf]  ;;  %v4020_v5 = vld [vmem:[#allocation8 + $0x494] sm:$0xf0] }
  0xb7   :  { %1912 = vmatpush.bf16.msra.mxu1 %v2806_v61  ;;  %1925 = vmatpush.bf16.msra.mxu2 %v2934_v62  ;;  %v4088_v61 = vld [vmem:[#allocation8 + $0x6b4] sm:$0xf0]  ;;  %v3621_v62 = vld [vmem:[#allocation8 + $0x7a8] sm:$0xf] }
  0xb8   :  { %1938 = vmatpush.bf16.msra.mxu3 %v3062_v2  ;;  %v3494_v2 = vor.u32 %v4088_v61, %v3493_v60  ;;  %v3349_v7 = vld [vmem:[#allocation8 + $0x588] sm:$0xf]  ;;  %v3622_v8 = vor.u32 %v4120_v63, %v3621_v62  ;;  %v4052_v9 = vld [vmem:[#allocation8 + $0x594] sm:$0xf0] }
  0xb9   :  { %1900 = vmatpush.bf16.msra.mxu0 %v2662_v10  ;;  %v3477_v10 = vld [vmem:[#allocation8 + $0x688] sm:$0xf]  ;;  %v4084_v11 = vld [vmem:[#allocation8 + $0x694] sm:$0xf0]  ;;  %v3350_v15 = vor.u32 %v4052_v9, %v3349_v7 }
  0xba   :  { %v3605_v12 = vld [vmem:[#allocation8 + $0x788] sm:$0xf]  ;;  %v3478_v16 = vor.u32 %v4084_v11, %v3477_v10  ;;  %v4048_v23 = vld [vmem:[#allocation8 + $0x574] sm:$0xf0] }
  0xbb   :  { %1913 = vmatpush.bf16.msra.mxu1 %v2790_v13  ;;  %1926 = vmatpush.bf16.msra.mxu2 %v2918_v14  ;;  %v4116_v13 = vld [vmem:[#allocation8 + $0x794] sm:$0xf0]  ;;  %v3222_v14 = vor.u32 %v4020_v5, %v3221_v3  ;;  %v3205_v17 = vld [vmem:[#allocation8 + $0x468] sm:$0xf] }
  0xbc   :  { %1939 = vmatpush.bf16.msra.mxu3 %v3046_v18  ;;  %v4016_v18 = vld [vmem:[#allocation8 + $0x474] sm:$0xf0]  ;;  %v3333_v19 = vld [vmem:[#allocation8 + $0x568] sm:$0xf]  ;;  %v3606_v22 = vor.u32 %v4116_v13, %v3605_v12  ;;  %v3902_v13 = vld [vmem:[#allocation8 + $0xec] sm:$0xf] }
  0xbd   :  { %1901 = vmatpush.bf16.msra.mxu0 %v2646_v27  ;;  %v3461_v24 = vld [vmem:[#allocation8 + $0x668] sm:$0xf]  ;;  %v4080_v25 = vld [vmem:[#allocation8 + $0x674] sm:$0xf0]  ;;  %v3206_v28 = vor.u32 %v4016_v18, %v3205_v17  ;;  %v3334_v29 = vor.u32 %v4048_v23, %v3333_v19  ;;  %v2887_v18 = vld [vmem:[#allocation8 + $0x1f8] sm:$0xf0] }
  0xbe   :  { %v3589_v26 = vld [vmem:[#allocation8 + $0x768] sm:$0xf]  ;;  %v4112_v27 = vld [vmem:[#allocation8 + $0x774] sm:$0xf0]  ;;  %v3462_v30 = vor.u32 %v4080_v25, %v3461_v24  ;;  %v3966_v19 = vld [vmem:[#allocation8 + $0x2ec] sm:$0xf] }
  0xbf   :  { %1914 = vmatpush.bf16.msra.mxu1 %v2774_v31  ;;  %1927 = vmatpush.bf16.msra.mxu2 %v2902_v32  ;;  %v3189_v31 = vld [vmem:[#allocation8 + $0x448] sm:$0xf]  ;;  %v4012_v32 = vld [vmem:[#allocation8 + $0x454] sm:$0xf0]  ;;  %v3590_v34 = vor.u32 %v4112_v27, %v3589_v26  ;;  %v3998_v26 = vld [vmem:[#allocation8 + $0x3ec] sm:$0xf] }
  0xc0   :  { %1940 = vmatpush.bf16.msra.mxu3 %v3030_v35  ;;  %1902 = vmatmul.bf16.vlgmr.msra.gmra.mxu0 %v4427_v20  ;;  %v3317_v33 = vld [vmem:[#allocation8 + $0x548] sm:$0xf]  ;;  %v4044_v35 = vld [vmem:[#allocation8 + $0x554] sm:$0xf0]  ;;  %v3190_v45 = vor.u32 %v4012_v32, %v3189_v31  ;;  %v3143_v27 = vld [vmem:[#allocation8 + $0x3f8] sm:$0xf0] }
  0xc1   :  { %1946 = vmatpush.bf16.msrb.mxu0 %v3270_v36  ;;  %v3445_v36 = vld [vmem:[#allocation8 + $0x648] sm:$0xf]  ;;  %v4108_v40 = vld [vmem:[#allocation8 + $0x754] sm:$0xf0]  ;;  %v3318_v47 = vor.u32 %v4044_v35, %v3317_v33  ;;  %v2743_v35 = vld [vmem:[#allocation8 + $0xd8] sm:$0xf0] }
  0xc2   :  { %1928 = vmatmul.bf16.vlgmr.msra.gmra.mxu2 %v4422_v4  ;;  %1915 = vmatmul.bf16.vlgmr.msra.gmra.mxu1 %v4430_v21  ;;  %v3173_v49 = vld [vmem:[#allocation8 + $0x428] sm:$0xf]  ;;  %v4008_v50 = vld [vmem:[#allocation8 + $0x434] sm:$0xf0] }
  0xc3   :  { %1959 = vmatpush.bf16.msrb.mxu1 %v3398_v37  ;;  %1972 = vmatpush.bf16.msrb.mxu2 %v3526_v39  ;;  %v4076_v37 = vld [vmem:[#allocation8 + $0x654] sm:$0xf0]  ;;  %v3573_v39 = vld [vmem:[#allocation8 + $0x748] sm:$0xf]  ;;  %v3174_v62 = vor.u32 %v4008_v50, %v3173_v49  ;;  %v3894_v50 = vld [vmem:[#allocation8 + $0xac] sm:$0xf] }
  0xc4   :  { %1985 = vmatpush.bf16.msrb.mxu3 %v3654_v46  ;;  %v3446_v48 = vor.u32 %v4076_v37, %v3445_v36  ;;  %v3301_v51 = vld [vmem:[#allocation8 + $0x528] sm:$0xf]  ;;  %v4040_v55 = vld [vmem:[#allocation8 + $0x534] sm:$0xf0]  ;;  %v3930_v36 = vld [vmem:[#allocation8 + $0x1cc] sm:$0xf]  ;;  %v3146_v37 = vor.u32 %v3998_v26, %v3143_v27 }
  0xc5   :  { %1941 = vmatmul.bf16.vlgmr.msra.gmra.mxu3 %v4424_v6  ;;  %1947 = vmatpush.bf16.msrb.mxu0 %v3254_v52  ;;  %v3429_v56 = vld [vmem:[#allocation8 + $0x628] sm:$0xf]  ;;  %v4072_v57 = vld [vmem:[#allocation8 + $0x634] sm:$0xf0]  ;;  %v3079_v26 = vld [vmem:[#allocation8 + $0x378] sm:$0xf0] }
  0xc6   :  { %v3557_v59 = vld [vmem:[#allocation8 + $0x728] sm:$0xf]  ;;  %v4104_v60 = vld [vmem:[#allocation8 + $0x734] sm:$0xf0] }
  0xc7   :  { %1960 = vmatpush.bf16.msrb.mxu1 %v3382_v53  ;;  %1973 = vmatpush.bf16.msrb.mxu2 %v3510_v54  ;;  %v1721_v53 = vpop.f32.mrf.mxu2  ;;  %v3574_v54 = vor.u32 %v4108_v40, %v3573_v39  ;;  %v3157_v63 = vld [vmem:[#allocation8 + $0x408] sm:$0xf]  ;;  %v4036_v5 = vld [vmem:[#allocation8 + $0x514] sm:$0xf0]  ;;  %v3558_v9 = vor.u32 %v4104_v60, %v3557_v59  ;;  %v2871_v39 = vld [vmem:[#allocation8 + $0x1d8] sm:$0xf0] }
  0xc8   :  { %1986 = vmatpush.bf16.msrb.mxu3 %v3638_v58  ;;  %v1734_v58 = vpop.f32.mrf.mxu3  ;;  %v3285_v3 = vld [vmem:[#allocation8 + $0x508] sm:$0xf]  ;;  %v4068_v10 = vld [vmem:[#allocation8 + $0x614] sm:$0xf0]  ;;  %v3962_v40 = vld [vmem:[#allocation8 + $0x2cc] sm:$0xf] }
  0xc9   :  { %1948 = vmatpush.bf16.msrb.mxu0 %v3238_v0  ;;  %v4004_v0 = vld [vmem:[#allocation8 + $0x414] sm:$0xf0]  ;;  %v3413_v7 = vld [vmem:[#allocation8 + $0x608] sm:$0xf]  ;;  %v3286_v24 = vor.u32 %v4036_v5, %v3285_v3  ;;  %v3954_v3 = vld [vmem:[#allocation8 + $0x28c] sm:$0xf] }
  0xca   :  { %v3541_v11 = vld [vmem:[#allocation8 + $0x708] sm:$0xf]  ;;  %v4100_v12 = vld [vmem:[#allocation8 + $0x714] sm:$0xf0]  ;;  %v3158_v17 = vor.u32 %v4004_v0, %v3157_v63  ;;  %v3414_v25 = vor.u32 %v4068_v10, %v3413_v7  ;;  %v2711_v63 = vld [vmem:[#allocation8 + $0x98] sm:$0xf0] }
  0xcb   :  { %1961 = vmatpush.bf16.msrb.mxu1 %v3366_v1  ;;  %1974 = vmatpush.bf16.msrb.mxu2 %v3494_v2  ;;  %v1695_v43 = vpop.f32.mrf.mxu0  ;;  %v1708_v46 = vpop.f32.mrf.mxu1  ;;  %v3302_v1 = vor.u32 %v4040_v55, %v3301_v51  ;;  %v3430_v2 = vor.u32 %v4072_v57, %v3429_v56  ;;  %v2727_v51 = vld [vmem:[#allocation8 + $0xb8] sm:$0xf0]  ;;  %v3958_v55 = vld [vmem:[#allocation8 + $0x2ac] sm:$0xf] }
  0xcc   :  { %1987 = vmatpush.bf16.msrb.mxu3 %v3622_v8  ;;  %v1709_v52 = vadd.f32 %v1708_v46, %v1695_v43  ;;  %v2999_v43 = vld [vmem:[#allocation8 + $0x2d8] sm:$0xf0]  ;;  %v3990_v57 = vld [vmem:[#allocation8 + $0x3ac] sm:$0xf]  ;;  %v2730_v59 = vor.u32 %v3894_v50, %v2727_v51 }
  0xcd   :  { %1949 = vmatpush.bf16.msrb.mxu0 %v3222_v14  ;;  %v2759_v14 = vld [vmem:[#allocation8 + $0xf8] sm:$0xf0]  ;;  %v3002_v49 = vor.u32 %v3962_v40, %v2999_v43  ;;  %v3922_v0 = vld [vmem:[#allocation8 + $0x18c] sm:$0xf] }
  0xce   :  { %v1722_v61 = vadd.f32 %v1721_v53, %v1709_v52  ;;  %v3127_v46 = vld [vmem:[#allocation8 + $0x3d8] sm:$0xf0]  ;;  %v3926_v52 = vld [vmem:[#allocation8 + $0x1ac] sm:$0xf] }
  0xcf   :  { %1962 = vmatpush.bf16.msrb.mxu1 %v3350_v15  ;;  %1975 = vmatpush.bf16.msrb.mxu2 %v3478_v16  ;;  %v3934_v15 = vld [vmem:[#allocation8 + $0x1ec] sm:$0xf]  ;;  %v2983_v56 = vld [vmem:[#allocation8 + $0x2b8] sm:$0xf0] }
  0xd0   :  { %1988 = vmatpush.bf16.msrb.mxu3 %v3606_v22  ;;  %v4458_v8 = vadd.f32 %v1734_v58, %v1722_v61  ;;  %v3015_v22 = vld [vmem:[#allocation8 + $0x2f8] sm:$0xf0]  ;;  %v1736_v31 = vpop.f32.mrf.mxu3  ;;  %v2890_v32 = vor.u32 %v3934_v15, %v2887_v18  ;;  %v2986_v61 = vor.u32 %v3958_v55, %v2983_v56  ;;  %v3986_v7 = vld [vmem:[#allocation8 + $0x38c] sm:$0xf] }
  0xd1   :  { %1950 = vmatpush.bf16.msrb.mxu0 %v3206_v28  ;;  %v1723_v28 = vpop.f32.mrf.mxu2  ;;  %v3018_v33 = vor.u32 %v3966_v19, %v3015_v22  ;;  %v3111_v58 = vld [vmem:[#allocation8 + $0x3b8] sm:$0xf0]  ;;  %v3882_v31 = vld [vmem:[#allocation8 + $0x4c] sm:$0xf] }
  0xd2   :  { %v2967_v5 = vld [vmem:[#allocation8 + $0x298] sm:$0xf0]  ;;  %v3978_v43 = vld [vmem:[#allocation8 + $0x34c] sm:$0xf] }
  0xd3   :  { %1963 = vmatpush.bf16.msrb.mxu1 %v3334_v29  ;;  %1976 = vmatpush.bf16.msrb.mxu2 %v3462_v30  ;;  %v1697_v16 = vpop.f32.mrf.mxu0  ;;  %v1710_v23 = vpop.f32.mrf.mxu1  ;;  %v3542_v29 = vor.u32 %v4100_v12, %v3541_v11  ;;  %v2762_v30 = vor.u32 %v3902_v13, %v2759_v14  ;;  %v2970_v13 = vor.u32 %v3954_v3, %v2967_v5  ;;  %v3886_v14 = vld [vmem:[#allocation8 + $0x6c] sm:$0xf]  ;;  %v2695_v15 = vld [vmem:[#allocation8 + $0x78] sm:$0xf0] }
  0xd4   :  { %1989 = vmatpush.bf16.msrb.mxu3 %v3590_v34  ;;  %v3898_v34 = vld [vmem:[#allocation8 + $0xcc] sm:$0xf]  ;;  %v2823_v22 = vld [vmem:[#allocation8 + $0x178] sm:$0xf0]  ;;  %v2698_v28 = vor.u32 %v3886_v14, %v2695_v15 }
  0xd5   :  { %1951 = vmatpush.bf16.msrb.mxu0 %v3190_v45  ;;  %v3994_v45 = vld [vmem:[#allocation8 + $0x3cc] sm:$0xf]  ;;  %v2791_v56 = vld [vmem:[#allocation8 + $0x138] sm:$0xf0] }
  0xd6   :  { %v3130_v53 = vor.u32 %v3994_v45, %v3127_v46  ;;  %v3918_v16 = vld [vmem:[#allocation8 + $0x16c] sm:$0xf]  ;;  %v3063_v45 = vld [vmem:[#allocation8 + $0x358] sm:$0xf0] }
  0xd7   :  { %1964 = vmatpush.bf16.msrb.mxu1 %v3318_v47  ;;  %1977 = vmatpush.bf16.msrb.mxu2 %v3446_v48  ;;  %v2746_v47 = vor.u32 %v3898_v34, %v2743_v35  ;;  %v2874_v48 = vor.u32 %v3930_v36, %v2871_v39  ;;  %v3950_v23 = vld [vmem:[#allocation8 + $0x26c] sm:$0xf]  ;;  %v2807_v35 = vld [vmem:[#allocation8 + $0x158] sm:$0xf0]  ;;  %v3066_v55 = vor.u32 %v3978_v43, %v3063_v45 }
  0xd8   :  { %1990 = vmatpush.bf16.msrb.mxu3 %v3574_v54  ;;  %v2855_v54 = vld [vmem:[#allocation8 + $0x1b8] sm:$0xf0]  ;;  %v3946_v36 = vld [vmem:[#allocation8 + $0x24c] sm:$0xf] }
  0xd9   :  { %1952 = vmatpush.bf16.msrb.mxu0 %v3174_v62  ;;  %v2858_v60 = vor.u32 %v3926_v52, %v2855_v54  ;;  %v3890_v62 = vld [vmem:[#allocation8 + $0x8c] sm:$0xf]  ;;  %v2663_v52 = vld [vmem:[#allocation8 + $0x38] sm:$0xf0] }
  0xda   :  { %v2714_v10 = vor.u32 %v3890_v62, %v2711_v63  ;;  %v3878_v51 = vld [vmem:[#allocation8 + $0x2c] sm:$0xf]  ;;  %v2647_v63 = vld [vmem:[#allocation8 + $0x18] sm:$0xf0] }
  0xdb   :  { %1965 = vmatpush.bf16.msrb.mxu1 %v3302_v1  ;;  %1978 = vmatpush.bf16.msrb.mxu2 %v3430_v2  ;;  %v3114_v1 = vor.u32 %v3990_v57, %v3111_v58  ;;  %v2839_v2 = vld [vmem:[#allocation8 + $0x198] sm:$0xf0]  ;;  %v3942_v57 = vld [vmem:[#allocation8 + $0x22c] sm:$0xf] }
  0xdc   :  { %1991 = vmatpush.bf16.msrb.mxu3 %v3558_v9  ;;  %v3095_v9 = vld [vmem:[#allocation8 + $0x398] sm:$0xf0]  ;;  %v2842_v12 = vor.u32 %v3922_v0, %v2839_v2  ;;  %v3874_v62 = vld [vmem:[#allocation8 + $0xc] sm:$0xf] }
  0xdd   :  { %1953 = vmatpush.bf16.msrb.mxu0 %v3158_v17  ;;  %v3098_v19 = vor.u32 %v3986_v7, %v3095_v9  ;;  %v2919_v58 = vld [vmem:[#allocation8 + $0x238] sm:$0xf0]  ;;  %v3906_v2 = vld [vmem:[#allocation8 + $0x10c] sm:$0xf] }
  0xde   :  { %v2775_v3 = vld [vmem:[#allocation8 + $0x118] sm:$0xf0]  ;;  %v3938_v5 = vld [vmem:[#allocation8 + $0x20c] sm:$0xf] }
  0xdf   :  { %1966 = vmatpush.bf16.msrb.mxu1 %v3286_v24  ;;  %1979 = vmatpush.bf16.msrb.mxu2 %v3414_v25  ;;  %v1747_v11 = vpop.f32.mrf.mxu0  ;;  %v2951_v24 = vld [vmem:[#allocation8 + $0x278] sm:$0xf0]  ;;  %v3982_v25 = vld [vmem:[#allocation8 + $0x36c] sm:$0xf] }
  0xe0   :  { %1992 = vmatpush.bf16.msrb.mxu3 %v3542_v29  ;;  %1954 = vmatmul.bf16.vlgmr.msrb.gmra.mxu0 %v4436_v41  ;;  %v1748_v17 = vadd.f32 %v1747_v11, %v4458_v8  ;;  %v2826_v29 = vor.u32 %v3918_v16, %v2823_v22  ;;  %v3082_v8 = vor.u32 %v3982_v25, %v3079_v26  ;;  %v3970_v11 = vld [vmem:[#allocation8 + $0x30c] sm:$0xf]  ;;  %v3271_v15 = vld [vmem:[#allocation8 + $0x4f8] sm:$0xf0] }
  0xe1   :  { %1998 = vmatpush.bf16.msra.mxu0 %v2762_v30  ;;  %v1760_v18 = vpop.f32.mrf.mxu1  ;;  %v2954_v30 = vor.u32 %v3950_v23, %v2951_v24  ;;  %v4030_v14 = vld [vmem:[#allocation8 + $0x4ec] sm:$0xf]  ;;  %v3527_v22 = vld [vmem:[#allocation8 + $0x6f8] sm:$0xf0]  ;;  %v2778_v23 = vor.u32 %v3906_v2, %v2775_v3 }
  0xe2   :  { %1980 = vmatmul.bf16.vlgmr.msrb.gmra.mxu2 %v4434_v38  ;;  %1967 = vmatmul.bf16.vlgmr.msrb.gmra.mxu1 %v4440_v44  ;;  %v1761_v27 = vadd.f32 %v1760_v18, %v1748_v17  ;;  %v4062_v16 = vld [vmem:[#allocation8 + $0x5ec] sm:$0xf]  ;;  %v2650_v17 = vor.u32 %v3874_v62, %v2647_v63  ;;  %v3399_v18 = vld [vmem:[#allocation8 + $0x5f8] sm:$0xf0] }
  0xe3   :  { %2011 = vmatpush.bf16.msra.mxu1 %v2890_v32  ;;  %2024 = vmatpush.bf16.msra.mxu2 %v3018_v33  ;;  %v2679_v32 = vld [vmem:[#allocation8 + $0x58] sm:$0xf0]  ;;  %v3914_v33 = vld [vmem:[#allocation8 + $0x14c] sm:$0xf] }
  0xe4   :  { %2037 = vmatpush.bf16.msra.mxu3 %v3146_v37  ;;  %v2935_v37 = vld [vmem:[#allocation8 + $0x258] sm:$0xf0]  ;;  %v2682_v46 = vor.u32 %v3882_v31, %v2679_v32  ;;  %v4126_v25 = vld [vmem:[#allocation8 + $0x7ec] sm:$0xf] }
  0xe5   :  { %1993 = vmatmul.bf16.vlgmr.msrb.gmra.mxu3 %v4438_v42  ;;  %1999 = vmatpush.bf16.msra.mxu0 %v2746_v47  ;;  %v1773_v34 = vpop.f32.mrf.mxu2  ;;  %v2938_v50 = vor.u32 %v3946_v36, %v2935_v37  ;;  %v3655_v26 = vld [vmem:[#allocation8 + $0x7f8] sm:$0xf0]  ;;  %v4026_v31 = vld [vmem:[#allocation8 + $0x4cc] sm:$0xf] }
  0xe6   :  { %v1774_v39 = vadd.f32 %v1773_v34, %v1761_v27  ;;  %v3255_v32 = vld [vmem:[#allocation8 + $0x4d8] sm:$0xf0]  ;;  %v3658_v34 = vor.u32 %v4126_v25, %v3655_v26  ;;  %v4122_v37 = vld [vmem:[#allocation8 + $0x7cc] sm:$0xf] }
  0xe7   :  { %2012 = vmatpush.bf16.msra.mxu1 %v2874_v48  ;;  %2025 = vmatpush.bf16.msra.mxu2 %v3002_v49  ;;  %v1749_v48 = vpop.f32.mrf.mxu0  ;;  %v2810_v49 = vor.u32 %v3914_v33, %v2807_v35  ;;  %v4058_v33 = vld [vmem:[#allocation8 + $0x5cc] sm:$0xf]  ;;  %v3511_v36 = vld [vmem:[#allocation8 + $0x6d8] sm:$0xf0] }
  0xe8   :  { %2038 = vmatpush.bf16.msra.mxu3 %v3130_v53  ;;  %v1786_v40 = vpop.f32.mrf.mxu3  ;;  %v3910_v53 = vld [vmem:[#allocation8 + $0x12c] sm:$0xf]  ;;  %v3239_v48 = vld [vmem:[#allocation8 + $0x4b8] sm:$0xf0] }
  0xe9   :  { %2000 = vmatpush.bf16.msra.mxu0 %v2730_v59  ;;  %v4465_v47 = vadd.f32 %v1786_v40, %v1774_v39  ;;  %v1762_v54 = vpop.f32.mrf.mxu1  ;;  %v3974_v59 = vld [vmem:[#allocation8 + $0x32c] sm:$0xf]  ;;  %v2794_v0 = vor.u32 %v3910_v53, %v2791_v56  ;;  %v3639_v39 = vld [vmem:[#allocation8 + $0x7d8] sm:$0xf0]  ;;  %v3258_v40 = vor.u32 %v4026_v31, %v3255_v32 }
  0xea   :  { %v4090_v35 = vld [vmem:[#allocation8 + $0x6cc] sm:$0xf]  ;;  %v3495_v53 = vld [vmem:[#allocation8 + $0x6b8] sm:$0xf0] }
  0xeb   :  { %2013 = vmatpush.bf16.msra.mxu1 %v2858_v60  ;;  %2026 = vmatpush.bf16.msra.mxu2 %v2986_v61  ;;  %v3047_v60 = vld [vmem:[#allocation8 + $0x338] sm:$0xf0]  ;;  %v2666_v61 = vor.u32 %v3878_v51, %v2663_v52  ;;  %v3514_v45 = vor.u32 %v4090_v35, %v3511_v36  ;;  %v4086_v52 = vld [vmem:[#allocation8 + $0x6ac] sm:$0xf] }
  0xec   :  { %2039 = vmatpush.bf16.msra.mxu3 %v3114_v1  ;;  %v2922_v1 = vor.u32 %v3942_v57, %v2919_v58  ;;  %v3050_v9 = vor.u32 %v3974_v59, %v3047_v60  ;;  %v3367_v51 = vld [vmem:[#allocation8 + $0x5b8] sm:$0xf0]  ;;  %v4118_v54 = vld [vmem:[#allocation8 + $0x7ac] sm:$0xf]  ;;  %v3498_v58 = vor.u32 %v4086_v52, %v3495_v53 }
  0xed   :  { %2001 = vmatpush.bf16.msra.mxu0 %v2714_v10  ;;  %v1775_v7 = vpop.f32.mrf.mxu2  ;;  %v2903_v10 = vld [vmem:[#allocation8 + $0x218] sm:$0xf0]  ;;  %v4018_v59 = vld [vmem:[#allocation8 + $0x48c] sm:$0xf] }
  0xee   :  { %v2906_v24 = vor.u32 %v3938_v5, %v2903_v10  ;;  %v3223_v60 = vld [vmem:[#allocation8 + $0x498] sm:$0xf0]  ;;  %v4082_v63 = vld [vmem:[#allocation8 + $0x68c] sm:$0xf] }
  0xef   :  { %2014 = vmatpush.bf16.msra.mxu1 %v2842_v12  ;;  %2027 = vmatpush.bf16.msra.mxu2 %v2970_v13  ;;  %v3031_v12 = vld [vmem:[#allocation8 + $0x318] sm:$0xf0]  ;;  %v4014_v5 = vld [vmem:[#allocation8 + $0x46c] sm:$0xf] }
  0xf0   :  { %2040 = vmatpush.bf16.msra.mxu3 %v3098_v19  ;;  %v1788_v13 = vpop.f32.mrf.mxu3  ;;  %v4094_v19 = vld [vmem:[#allocation8 + $0x6ec] sm:$0xf]  ;;  %v3034_v27 = vor.u32 %v3970_v11, %v3031_v12  ;;  %v3351_v62 = vld [vmem:[#allocation8 + $0x598] sm:$0xf0] }
  0xf1   :  { %2002 = vmatpush.bf16.msra.mxu0 %v2698_v28  ;;  %v3274_v28 = vor.u32 %v4030_v14, %v3271_v15  ;;  %v3207_v7 = vld [vmem:[#allocation8 + $0x478] sm:$0xf0]  ;;  %v4078_v13 = vld [vmem:[#allocation8 + $0x66c] sm:$0xf] }
  0xf2   :  { %v3335_v12 = vld [vmem:[#allocation8 + $0x578] sm:$0xf0]  ;;  %v4110_v15 = vld [vmem:[#allocation8 + $0x76c] sm:$0xf] }
  0xf3   :  { %2015 = vmatpush.bf16.msra.mxu1 %v2826_v29  ;;  %2028 = vmatpush.bf16.msra.mxu2 %v2954_v30  ;;  %v3402_v29 = vor.u32 %v4062_v16, %v3399_v18  ;;  %v3530_v30 = vor.u32 %v4094_v19, %v3527_v22  ;;  %v3463_v14 = vld [vmem:[#allocation8 + $0x678] sm:$0xf0]  ;;  %v4010_v22 = vld [vmem:[#allocation8 + $0x44c] sm:$0xf] }
  0xf4   :  { %2041 = vmatpush.bf16.msra.mxu3 %v3082_v8  ;;  %v3383_v8 = vld [vmem:[#allocation8 + $0x5d8] sm:$0xf0]  ;;  %v3466_v19 = vor.u32 %v4078_v13, %v3463_v14  ;;  %v4106_v31 = vld [vmem:[#allocation8 + $0x74c] sm:$0xf] }
  0xf5   :  { %2003 = vmatpush.bf16.msra.mxu0 %v2682_v46  ;;  %v3386_v43 = vor.u32 %v4058_v33, %v3383_v8  ;;  %v4022_v46 = vld [vmem:[#allocation8 + $0x4ac] sm:$0xf]  ;;  %v3591_v16 = vld [vmem:[#allocation8 + $0x778] sm:$0xf0] }
  0xf6   :  { %v3242_v56 = vor.u32 %v4022_v46, %v3239_v48  ;;  %v3594_v26 = vor.u32 %v4110_v15, %v3591_v16  ;;  %v3575_v32 = vld [vmem:[#allocation8 + $0x758] sm:$0xf0]  ;;  %v4006_v36 = vld [vmem:[#allocation8 + $0x42c] sm:$0xf]  ;;  %v4133_v15 = vld [vmem:[#allocation10 + $0x20] sm:$0xff] }
  0xf7   :  { %2016 = vmatpush.bf16.msra.mxu1 %v2810_v49  ;;  %2029 = vmatpush.bf16.msra.mxu2 %v2938_v50  ;;  %v4054_v49 = vld [vmem:[#allocation8 + $0x5ac] sm:$0xf]  ;;  %v3642_v50 = vor.u32 %v4122_v37, %v3639_v39  ;;  %v3175_v37 = vld [vmem:[#allocation8 + $0x438] sm:$0xf0] }
  0xf8   :  { %2042 = vmatpush.bf16.msra.mxu3 %v3066_v55  ;;  %v3623_v55 = vld [vmem:[#allocation8 + $0x7b8] sm:$0xf0]  ;;  %v3370_v57 = vor.u32 %v4054_v49, %v3367_v51  ;;  %v4038_v39 = vld [vmem:[#allocation8 + $0x52c] sm:$0xf]  ;;  %v3178_v51 = vor.u32 %v4006_v36, %v3175_v37  ;;  %v4129_v36 = vld [vmem:[#allocation10] sm:$0xff] }
  0xf9   :  { %2004 = vmatpush.bf16.msra.mxu0 %v2666_v61  ;;  %v3626_v61 = vor.u32 %v4118_v54, %v3623_v55  ;;  %v4070_v46 = vld [vmem:[#allocation8 + $0x62c] sm:$0xf]  ;;  %v3431_v48 = vld [vmem:[#allocation8 + $0x638] sm:$0xf0]  ;;  %v4137_v37 = vld [vmem:[#allocation10 + $0x40] sm:$0xff] }
  0xfa   :  { %v4102_v49 = vld [vmem:[#allocation8 + $0x72c] sm:$0xf]  ;;  %v3434_v53 = vor.u32 %v4070_v46, %v3431_v48  ;;  %v3159_v55 = vld [vmem:[#allocation8 + $0x418] sm:$0xf0] }
  0xfb   :  { %2017 = vmatpush.bf16.msra.mxu1 %v2794_v0  ;;  %2030 = vmatpush.bf16.msra.mxu2 %v2922_v1  ;;  %v3479_v0 = vld [vmem:[#allocation8 + $0x698] sm:$0xf0]  ;;  %v4114_v1 = vld [vmem:[#allocation8 + $0x78c] sm:$0xf] }
  0xfc   :  { %2043 = vmatpush.bf16.msra.mxu3 %v3050_v9  ;;  %v3482_v3 = vor.u32 %v4082_v63, %v3479_v0  ;;  %v4046_v9 = vld [vmem:[#allocation8 + $0x56c] sm:$0xf]  ;;  %v3543_v63 = vld [vmem:[#allocation8 + $0x718] sm:$0xf0] }
  0xfd   :  { %2005 = vmatpush.bf16.msra.mxu0 %v2650_v17  ;;  %v4471_v2 = vpop.f32.mrf.mxu0  ;;  %v3210_v17 = vor.u32 %v4014_v5, %v3207_v7  ;;  %v3338_v18 = vor.u32 %v4046_v9, %v3335_v12  ;;  %v4002_v54 = vld [vmem:[#allocation8 + $0x40c] sm:$0xf]  ;;  %v4135_v7 = vld [vmem:[#allocation10 + $0x30] sm:$0xff]  ;;  %v4152_v9 = vld [vmem:[#allocation10 + $0xb8] sm:$0xff] }
  0xfe   :  { %v3162_v0 = vor.u32 %v4002_v54, %v3159_v55  ;;  %v4134_v13 = vld [vmem:[#allocation10 + $0x28] sm:$0xff] }
  0xff   :  { %2018 = vmatpush.bf16.msra.mxu1 %v2778_v23  ;;  %2031 = vmatpush.bf16.msra.mxu2 %v2906_v24  ;;  %v4473_v10 = vpop.f32.mrf.mxu1  ;;  %v3191_v23 = vld [vmem:[#allocation8 + $0x458] sm:$0xf0]  ;;  %v4042_v24 = vld [vmem:[#allocation8 + $0x54c] sm:$0xf] }
 0x100   :  { %2044 = vmatpush.bf16.msra.mxu3 %v3034_v27  ;;  %2006 = vmatmul.bf16.vlgmr.msra.gmra.mxu0 %v4427_v20  ;;  %v3607_v20 = vld [vmem:[#allocation8 + $0x798] sm:$0xf0]  ;;  %v3194_v33 = vor.u32 %v4010_v22, %v3191_v23  ;;  %v1813_v5 = vadd.f32 %v4473_v10, %v4471_v2  ;;  %v4142_v14 = vld [vmem:[#allocation10 + $0x68] sm:$0xff]  ;;  %v4151_v2 = vld [vmem:[#allocation10 + $0xb0] sm:$0xff] }
 0x101   :  { %2050 = vmatpush.bf16.msrb.mxu0 %v3274_v28  ;;  %v3610_v11 = vor.u32 %v4114_v1, %v3607_v20  ;;  %v3319_v27 = vld [vmem:[#allocation8 + $0x558] sm:$0xf0]  ;;  %v4074_v28 = vld [vmem:[#allocation8 + $0x64c] sm:$0xf]  ;;  %v4149_v23 = vld [vmem:[#allocation10 + $0xa0] sm:$0xff] }
 0x102   :  { %2032 = vmatmul.bf16.vlgmr.msra.gmra.mxu2 %v4422_v4  ;;  %2019 = vmatmul.bf16.vlgmr.msra.gmra.mxu1 %v4430_v21  ;;  %v4050_v4 = vld [vmem:[#allocation8 + $0x58c] sm:$0xf]  ;;  %v3322_v8 = vor.u32 %v4042_v24, %v3319_v27  ;;  %v4139_v27 = vld [vmem:[#allocation10 + $0x50] sm:$0xff] }
 0x103   :  { %2063 = vmatpush.bf16.msrb.mxu1 %v3402_v29  ;;  %2076 = vmatpush.bf16.msrb.mxu2 %v3530_v30  ;;  %v3354_v21 = vor.u32 %v4050_v4, %v3351_v62  ;;  %v3447_v29 = vld [vmem:[#allocation8 + $0x658] sm:$0xf0]  ;;  %v4098_v62 = vld [vmem:[#allocation8 + $0x70c] sm:$0xf] }
 0x104   :  { %2089 = vmatpush.bf16.msrb.mxu3 %v3658_v34  ;;  %v3450_v35 = vor.u32 %v4074_v28, %v3447_v29  ;;  %v3415_v4 = vld [vmem:[#allocation8 + $0x618] sm:$0xf0]  ;;  %v4146_v46 = vld [vmem:[#allocation10 + $0x88] sm:$0xff] }
 0x105   :  { %2045 = vmatmul.bf16.vlgmr.msra.gmra.mxu3 %v4424_v6  ;;  %2051 = vmatpush.bf16.msrb.mxu0 %v3258_v40  ;;  %v3226_v6 = vor.u32 %v4018_v59, %v3223_v60  ;;  %v4475_v25 = vpop.f32.mrf.mxu2  ;;  %v1801_v34 = vpop.f32.mrf.mxu0  ;;  %v3287_v59 = vld [vmem:[#allocation8 + $0x518] sm:$0xf0]  ;;  %v4066_v60 = vld [vmem:[#allocation8 + $0x60c] sm:$0xf] }
 0x106   :  { %v3418_v20 = vor.u32 %v4066_v60, %v3415_v4  ;;  %v1826_v12 = vadd.f32 %v4475_v25, %v1813_v5  ;;  %v4131_v25 = vld [vmem:[#allocation10 + $0x10] sm:$0xff]  ;;  %v4148_v29 = vld [vmem:[#allocation10 + $0x98] sm:$0xff] }
 0x107   :  { %2064 = vmatpush.bf16.msrb.mxu1 %v3386_v43  ;;  %2077 = vmatpush.bf16.msrb.mxu2 %v3514_v45  ;;  %v1814_v40 = vpop.f32.mrf.mxu1  ;;  %v3578_v43 = vor.u32 %v4106_v31, %v3575_v32  ;;  %v3303_v45 = vld [vmem:[#allocation8 + $0x538] sm:$0xf0]  ;;  %v4130_v31 = vld [vmem:[#allocation10 + $0x8] sm:$0xff] }
 0x108   :  { %2090 = vmatpush.bf16.msrb.mxu3 %v3642_v50  ;;  %v4477_v30 = vpop.f32.mrf.mxu3  ;;  %v3559_v50 = vld [vmem:[#allocation8 + $0x738] sm:$0xf0]  ;;  %v3306_v52 = vor.u32 %v4038_v39, %v3303_v45  ;;  %v4138_v32 = vld [vmem:[#allocation10 + $0x48] sm:$0xff]  ;;  %v4366_v39 = vmov 1.0|1.0   ;;  %v4147_v40 = vld [vmem:[#allocation10 + $0x90] sm:$0xff] }
 0x109   :  { %2052 = vmatpush.bf16.msrb.mxu0 %v3242_v56  ;;  %v4034_v56 = vld [vmem:[#allocation8 + $0x50c] sm:$0xf]  ;;  %v1839_v10 = vadd.f32 %v4477_v30, %v1826_v12  ;;  %v4160_v4 = vld [vmem:[#allocation10 + $0xf8] sm:$0xff] }
 0x10a   :  { %v3290_v1 = vor.u32 %v4034_v56, %v3287_v59 }
 0x10b   :  { %2065 = vmatpush.bf16.msrb.mxu1 %v3370_v57  ;;  %2078 = vmatpush.bf16.msrb.mxu2 %v3498_v58  ;;  %v3562_v58 = vor.u32 %v4102_v49, %v3559_v50  ;;  %v4145_v50 = vld [vmem:[#allocation10 + $0x80] sm:$0xff] }
 0x10c   :  { %2091 = vmatpush.bf16.msrb.mxu3 %v3626_v61 }
 0x10d   :  { %2053 = vmatpush.bf16.msrb.mxu0 %v3226_v6  ;;  %v1827_v57 = vpop.f32.mrf.mxu2  ;;  %v3546_v6 = vor.u32 %v4098_v62, %v3543_v63 }
 0x10f   :  { %2066 = vmatpush.bf16.msrb.mxu1 %v3354_v21  ;;  %2079 = vmatpush.bf16.msrb.mxu2 %v3482_v3  ;;  %v4136_v21 = vld [vmem:[#allocation10 + $0x38] sm:$0xff] }
 0x110   :  { %2092 = vmatpush.bf16.msrb.mxu3 %v3610_v11  ;;  %v1840_v61 = vpop.f32.mrf.mxu3  ;;  %v4144_v3 = vld [vmem:[#allocation10 + $0x78] sm:$0xff]  ;;  %v4143_v11 = vld [vmem:[#allocation10 + $0x70] sm:$0xff] }
 0x111   :  { %2054 = vmatpush.bf16.msrb.mxu0 %v3210_v17  ;;  %v4150_v17 = vld [vmem:[#allocation10 + $0xa8] sm:$0xff] }
 0x113   :  { %2067 = vmatpush.bf16.msrb.mxu1 %v3338_v18  ;;  %2080 = vmatpush.bf16.msrb.mxu2 %v3466_v19  ;;  %v4140_v18 = vld [vmem:[#allocation10 + $0x58] sm:$0xff] }
 0x114   :  { %2093 = vmatpush.bf16.msrb.mxu3 %v3594_v26 }
 0x115   :  { %2055 = vmatpush.bf16.msrb.mxu0 %v3194_v33 }
 0x117   :  { %2068 = vmatpush.bf16.msrb.mxu1 %v3322_v8  ;;  %2081 = vmatpush.bf16.msrb.mxu2 %v3450_v35  ;;  %v4487_v8 = vstv %s2117_s3 }
 0x118   :  { %2094 = vmatpush.bf16.msrb.mxu3 %v3578_v43  ;;  %vm2119_vm0 = vcmp.ge.f32.partialorder %v4465_v47, %v4487_v8 }
 0x119   :  { %2056 = vmatpush.bf16.msrb.mxu0 %v3178_v51  ;;  %vm3791_vm2 = vmpackc.low %vm2119_vm0, %vm2119_vm0 }
 0x11b   :  { %2069 = vmatpush.bf16.msrb.mxu1 %v3306_v52  ;;  %2082 = vmatpush.bf16.msrb.mxu2 %v3434_v53 }
 0x11c   :  { %2095 = vmatpush.bf16.msrb.mxu3 %v3562_v58 }
 0x11d   :  { %2057 = vmatpush.bf16.msrb.mxu0 %v3162_v0  ;;  %v4159_v0 = vld [vmem:[#allocation10 + $0xf0] sm:$0xff] }
 0x11f   :  { %2070 = vmatpush.bf16.msrb.mxu1 %v3290_v1  ;;  %2083 = vmatpush.bf16.msrb.mxu2 %v3418_v20  ;;  %v1864_v16 = vpop.f32.mrf.mxu1 }
 0x120   :  { %2096 = vmatpush.bf16.msrb.mxu3 %v3546_v6  ;;  %2058 = vmatmul.bf16.vlgmr.msrb.gmra.mxu0 %v4436_v41  ;;  %v1851_v41 = vpop.f32.mrf.mxu0 }
 0x121   :  { %2391 = vmatpush.bf16.msra.mxu0 %v4136_v21  ;;  %v4158_v21 = vld [vmem:[#allocation10 + $0xe8] sm:$0xff] }
 0x122   :  { %2071 = vmatmul.bf16.vlgmr.msrb.gmra.mxu1 %v4440_v44  ;;  %2084 = vmatmul.bf16.vlgmr.msrb.gmra.mxu2 %v4434_v38  ;;  %v4141_v44 = vld [vmem:[#allocation10 + $0x60] sm:$0xff]  ;;  %v4132_v38 = vld [vmem:[#allocation10 + $0x18] sm:$0xff] }
 0x123   :  { %2404 = vmatpush.bf16.msra.mxu1 %v4144_v3  ;;  %2097 = vmatmul.bf16.vlgmr.msrb.gmra.mxu3 %v4438_v42  ;;  %v1852_v42 = vadd.f32 %v1851_v41, %v1839_v10 }
 0x124   :  { %2417 = vmatpush.bf16.msra.mxu2 %v4152_v9  ;;  %2430 = vmatpush.bf16.msra.mxu3 %v4160_v4  ;;  %v4156_v9 = vld [vmem:[#allocation10 + $0xd8] sm:$0xff]  ;;  %v2444_v4 = vstv %s3799_s5 }
 0x125   :  { %2392 = vmatpush.bf16.msra.mxu0 %v4135_v7  ;;  %v1877_v19 = vpop.f32.mrf.mxu2  ;;  %v1865_v24 = vadd.f32 %v1864_v16, %v1852_v42  ;;  %v4157_v7 = vld [vmem:[#allocation10 + $0xe0] sm:$0xff] }
 0x127   :  { %2405 = vmatpush.bf16.msra.mxu1 %v4143_v11  ;;  %v1866_v28 = vpop.f32.mrf.mxu1  ;;  %v1878_v30 = vadd.f32 %v1877_v19, %v1865_v24  ;;  %v4155_v11 = vld [vmem:[#allocation10 + $0xd0] sm:$0xff] }
 0x128   :  { %2418 = vmatpush.bf16.msra.mxu2 %v4151_v2  ;;  %v1890_v22 = vpop.f32.mrf.mxu3  ;;  %v1853_v26 = vpop.f32.mrf.mxu0  ;;  %2431 = vmatpush.bf16.msra.mxu3 %v4159_v0  ;;  %v2527_v0 = vstv %s3835_s26 }
 0x129   :  { %2393 = vmatpush.bf16.msra.mxu0 %v4134_v13  ;;  %v1891_v35 = vadd.f32 %v1890_v22, %v1878_v30 }
 0x12b   :  { %2406 = vmatpush.bf16.msra.mxu1 %v4142_v14  ;;  %vm2120_vm1 = vcmp.ge.f32.partialorder %v1891_v35, %v4487_v8  ;;  %v4154_v14 = vld [vmem:[#allocation10 + $0xc8] sm:$0xff] }
 0x12c   :  { %2419 = vmatpush.bf16.msra.mxu2 %v4150_v17  ;;  %vm3793_vm3 = vmpackc.low %vm2120_vm1, %vm2120_vm1  ;;  %2432 = vmatpush.bf16.msra.mxu3 %v4158_v21 }
 0x12d   :  { %2394 = vmatpush.bf16.msra.mxu0 %v4133_v15  ;;  %v1879_v33 = vpop.f32.mrf.mxu2  ;;  %v4153_v15 = vld [vmem:[#allocation10 + $0xc0] sm:$0xff] }
 0x12f   :  { %2407 = vmatpush.bf16.msra.mxu1 %v4141_v44 }
 0x130   :  { %2420 = vmatpush.bf16.msra.mxu2 %v4149_v23  ;;  %v1892_v34 = vpop.f32.mrf.mxu3  ;;  %2433 = vmatpush.bf16.msra.mxu3 %v4157_v7 }
 0x131   :  { %2395 = vmatpush.bf16.msra.mxu0 %v4132_v38 }
 0x133   :  { %2408 = vmatpush.bf16.msra.mxu1 %v4140_v18 }
 0x134   :  { %2421 = vmatpush.bf16.msra.mxu2 %v4148_v29  ;;  %2434 = vmatpush.bf16.msra.mxu3 %v4156_v9 }
 0x135   :  { %2396 = vmatpush.bf16.msra.mxu0 %v4131_v25 }
 0x137   :  { %2409 = vmatpush.bf16.msra.mxu1 %v4139_v27 }
 0x138   :  { %2422 = vmatpush.bf16.msra.mxu2 %v4147_v40  ;;  %2435 = vmatpush.bf16.msra.mxu3 %v4155_v11  ;;  %v4168_v40 = vld [vmem:[#allocation11 + $0x38] sm:$0xff] }
 0x139   :  { %2397 = vmatpush.bf16.msra.mxu0 %v4130_v31 }
 0x13b   :  { %2410 = vmatpush.bf16.msra.mxu1 %v4138_v32 }
 0x13c   :  { %2423 = vmatpush.bf16.msra.mxu2 %v4146_v46  ;;  %2436 = vmatpush.bf16.msra.mxu3 %v4154_v14  ;;  %v4165_v46 = vld [vmem:[#allocation11 + $0x20] sm:$0xff] }
 0x13d   :  { %2398 = vmatpush.bf16.msra.mxu0 %v4129_v36  ;;  %v1903_v43 = vpop.f32.mrf.mxu0 }
 0x13f   :  { %2411 = vmatpush.bf16.msra.mxu1 %v4137_v37  ;;  %v1916_v45 = vpop.f32.mrf.mxu1 }
 0x140   :  { %3792 = vmatmul.msk.bf16.vlgmr.msra.gmra.mxu0 %vm3791_vm2, %v4366_v39  ;;  %2424 = vmatpush.bf16.msra.mxu2 %v4145_v50  ;;  %v1917_v54 = vadd.f32 %v1916_v45, %v1903_v43  ;;  %v4167_v43 = vld [vmem:[#allocation11 + $0x30] sm:$0xff]  ;;  %v4166_v45 = vld [vmem:[#allocation11 + $0x28] sm:$0xff] }
 0x141   :  { %2437 = vmatpush.bf16.msra.mxu3 %v4153_v15  ;;  %2513 = vmatpush.bf16.msrb.mxu0 %v4168_v40 }
 0x142   :  { %3794 = vmatmul.msk.bf16.vlgmr.msra.gmra.mxu1 %vm3793_vm3, %v4366_v39 }
 0x145   :  { %v1929_v48 = vpop.f32.mrf.mxu2  ;;  %v1905_v47 = vpop.f32.mrf.mxu0  ;;  %2514 = vmatpush.bf16.msrb.mxu0 %v4167_v43 }
 0x146   :  { %v1930_v55 = vadd.f32 %v1929_v48, %v1917_v54  ;;  %v4164_v48 = vld [vmem:[#allocation11 + $0x18] sm:$0xff]  ;;  %v4174_v54 = vld [vmem:[#allocation13 + $0x28] sm:$0xff] }
 0x147   :  { %v1918_v51 = vpop.f32.mrf.mxu1 }
 0x148   :  { %v1942_v49 = vpop.f32.mrf.mxu3  ;;  %v4161_v51 = vld [vmem:[#allocation11] sm:$0xff] }
 0x149   :  { %v1943_v56 = vadd.f32 %v1942_v49, %v1930_v55  ;;  %2515 = vmatpush.bf16.msrb.mxu0 %v4166_v45  ;;  %v4162_v49 = vld [vmem:[#allocation11 + $0x8] sm:$0xff]  ;;  %v4173_v55 = vld [vmem:[#allocation13 + $0x20] sm:$0xff] }
 0x14d   :  { %v1931_v52 = vpop.f32.mrf.mxu2  ;;  %2516 = vmatpush.bf16.msrb.mxu0 %v4165_v46 }
 0x14e   :  { %v4176_v52 = vld [vmem:[#allocation13 + $0x38] sm:$0xff] }
 0x14f   :  { %2596 = vmatpush.bf16.msrb.mxu1 %v4176_v52 }
 0x150   :  { %v1944_v53 = vpop.f32.mrf.mxu3 }
 0x151   :  { %2517 = vmatpush.bf16.msrb.mxu0 %v4164_v48  ;;  %v4175_v53 = vld [vmem:[#allocation13 + $0x30] sm:$0xff] }
 0x153   :  { %2597 = vmatpush.bf16.msrb.mxu1 %v4175_v53 }
 0x157   :  { %2598 = vmatpush.bf16.msrb.mxu1 %v4174_v54 }
 0x15b   :  { %2599 = vmatpush.bf16.msrb.mxu1 %v4173_v55 }
 0x15d   :  { %v1955_v57 = vpop.f32.mrf.mxu0 }
 0x15e   :  { %v1956_v58 = vadd.f32 %v1955_v57, %v1943_v56  ;;  %v4172_v56 = vld [vmem:[#allocation13 + $0x18] sm:$0xff]  ;;  %v4171_v57 = vld [vmem:[#allocation13 + $0x10] sm:$0xff] }
 0x15f   :  { %v1968_v59 = vpop.f32.mrf.mxu1  ;;  %2600 = vmatpush.bf16.msrb.mxu1 %v4172_v56 }
 0x160   :  { %v1969_v60 = vadd.f32 %v1968_v59, %v1956_v58  ;;  %v4170_v58 = vld [vmem:[#allocation13 + $0x8] sm:$0xff] }
 0x163   :  { %2601 = vmatpush.bf16.msrb.mxu1 %v4171_v57 }
 0x165   :  { %v1981_v61 = vpop.f32.mrf.mxu2  ;;  %v1957_v20 = vpop.f32.mrf.mxu0 }
 0x166   :  { %v1982_v62 = vadd.f32 %v1981_v61, %v1969_v60 }
 0x167   :  { %v1970_v6 = vpop.f32.mrf.mxu1  ;;  %2602 = vmatpush.bf16.msrb.mxu1 %v4170_v58 }
 0x168   :  { %v1994_v63 = vpop.f32.mrf.mxu3  ;;  %v2610_v6 = vstv %s3871_s27 }
 0x169   :  { %v1995_v1 = vadd.f32 %v1994_v63, %v1982_v62  ;;  %v4169_v63 = vld [vmem:[#allocation13] sm:$0xff] }
 0x16b   :  { %vm2121_vm4 = vcmp.ge.f32.partialorder %v1995_v1, %v4487_v8  ;;  %2603 = vmatpush.bf16.msrb.mxu1 %v4169_v63 }
 0x16c   :  { %vm3795_vm5 = vmpackc.low %vm2121_vm4, %vm2121_vm4 }
 0x16d   :  { %3796 = vmatmul.msk.bf16.vlgmr.msra.gmra.mxu2 %vm3795_vm5, %v4366_v39  ;;  %v1983_v3 = vpop.f32.mrf.mxu2 }
 0x16e   :  { %v4368_v3 = vmov 0.0  }
 0x170   :  { %v1996_v5 = vpop.f32.mrf.mxu3 }
 0x17d   :  { %v2007_v12 = vpop.f32.mrf.mxu0 }
 0x17f   :  { %v2020_v13 = vpop.f32.mrf.mxu1 }
 0x180   :  { %v2021_v42 = vadd.f32 %v2020_v13, %v2007_v12 }
 0x185   :  { %v2033_v2 = vpop.f32.mrf.mxu2  ;;  %v2009_v41 = vpop.f32.mrf.mxu0 }
 0x186   :  { %v2034_v17 = vadd.f32 %v2033_v2, %v2021_v42 }
 0x187   :  { %v2022_v44 = vpop.f32.mrf.mxu1 }
 0x188   :  { %v2046_v10 = vpop.f32.mrf.mxu3 }
 0x189   :  { %v2047_v18 = vadd.f32 %v2046_v10, %v2034_v17 }
 0x18d   :  { %v2035_v16 = vpop.f32.mrf.mxu2 }
 0x190   :  { %v2048_v38 = vpop.f32.mrf.mxu3 }
 0x19d   :  { %v2059_v19 = vpop.f32.mrf.mxu0 }
 0x19e   :  { %v2060_v23 = vadd.f32 %v2059_v19, %v2047_v18 }
 0x19f   :  { %v2072_v22 = vpop.f32.mrf.mxu1 }
 0x1a0   :  { %v2073_v24 = vadd.f32 %v2072_v22, %v2060_v23 }
 0x1a5   :  { %v2085_v25 = vpop.f32.mrf.mxu2  ;;  %v2061_v28 = vpop.f32.mrf.mxu0 }
 0x1a6   :  { %v2086_v26 = vadd.f32 %v2085_v25, %v2073_v24  ;;  %v2098_v27 = vpop.f32.mrf.mxu3 }
 0x1a7   :  { %v2074_v29 = vpop.f32.mrf.mxu1 }
 0x1a8   :  { %v2099_v30 = vadd.f32 %v2098_v27, %v2086_v26 }
 0x1aa   :  { %vm2122_vm6 = vcmp.ge.f32.partialorder %v2099_v30, %v4487_v8  ;;  %v4163_v8 = vld [vmem:[#allocation11 + $0x10] sm:$0xff] }
 0x1ab   :  { %vm3797_vm7 = vmpackc.low %vm2122_vm6, %vm2122_vm6  ;;  %2518 = vmatpush.bf16.msrb.mxu0 %v4163_v8 }
 0x1ac   :  { %3798 = vmatmul.msk.bf16.vlgmr.msra.gmra.mxu3 %vm3797_vm7, %v4366_v39 }
 0x1ad   :  { %v2087_v31 = vpop.f32.mrf.mxu2 }
 0x1ae   :  { %v2100_v32 = vpop.f32.mrf.mxu3 }
 0x1af   :  { %2519 = vmatpush.bf16.msrb.mxu0 %v4162_v49 }
 0x1b3   :  { %2520 = vmatpush.bf16.msrb.mxu0 %v4161_v51 }
 0x1bd   :  { %v2400_v33 = vpop.f32.mrf.mxu0 }
 0x1bf   :  { %v2413_v34 = vpop.f32.mrf.mxu1 }
 0x1c0   :  { %v2414_v35 = vadd.f32 %v2413_v34, %v2400_v33 }
 0x1c5   :  { %v2402_v36 = vpop.f32.mrf.mxu0 }
 0x1c7   :  { %v2415_v37 = vpop.f32.mrf.mxu1 }
 0x1f0   :  { %v2426_v47 = vpop.f32.mrf.mxu2 }
 0x1f1   :  { %v2427_v59 = vadd.f32 %v2426_v47, %v2414_v35 }
 0x1f8   :  { %v2428_v50 = vpop.f32.mrf.mxu2 }
 0x22f   :  { %v2439_v60 = vpop.f32.mrf.mxu3 }
 0x230   :  { %v2440_v61 = vadd.f32 %v2439_v60, %v2427_v59 }
 0x232   :  { %vm2445_vm8 = vcmp.ge.f32.partialorder %v2440_v61, %v2444_v4 }
 0x233   :  { %vm3833_vm9 = vmpackc.low %vm2445_vm8, %vm2445_vm8 }
 0x234   :  { %3834 = vmatmul.msk.bf16.vlgmr.msrb.gmra.mxu0 %vm3833_vm9, %v4366_v39 }
 0x237   :  { %v2441_v62 = vpop.f32.mrf.mxu3 }
 0x2b1   :  { %v2522_v1 = vpop.f32.mrf.mxu0 }
 0x2b2   :  { %vm2528_vm10 = vcmp.ge.f32.partialorder %v2522_v1, %v2527_v0 }
 0x2b3   :  { %vm3869_vm11 = vmpackc.low %vm2528_vm10, %vm2528_vm10 }
 0x2b4   :  { %3870 = vmatmul.msk.bf16.vlgmr.msrb.gmra.mxu1 %vm3869_vm11, %v4366_v39 }
 0x2b9   :  { %v2524_v20 = vpop.f32.mrf.mxu0 }
 0x331   :  { %v2605_v21 = vpop.f32.mrf.mxu1 }
 0x332   :  { %vm2611_vm12 = vcmp.ge.f32.partialorder %v2605_v21, %v2610_v6 }
 0x333   :  { %v3872_v5 = vsel %vm2611_vm12, 1.0, %v4368_v3 }
 0x334   :  { %v2614_v7 = vpack.c.bf16 %v3872_v5, %v3872_v5 }
 0x336   :  { %2615 = vst [vmem:[#allocation14] sm:$0xf] %v2614_v7 }
 0x337   :  { %2626 = dma.vmem_to_hbm [thread:$0]  %s2622_s29, 64, %s2624_s7, [#allocation7]  }
 0x339   :  { %v2607_v9 = vpop.f32.mrf.mxu1 }
 0x33a   :  { %4354 = dma.done.wait [#allocation7], 64  }
 0x33b   :  { %4355 = vsyncadd [#allocation7], 4294967232 }
 0x33c   :  { %2631 = vsyncpa [#allocation6], 1 }
 0x33d   :  { %2632 = vsyncpa [#allocation9], 1 }
 0x33e   :  { %2633 = vsyncpa [#allocation12], 1 }
 0x33f   :  { %2634 = vsyncpa [#allocation7], 1 }

</bundles_post_ra>
